<compile_context>
chip_gen: v5e
topology: v5e:2x2
jax: 0.10.0
libtpu: 0.0.40
codegen_flags: <defaults>
</compile_context>

<pallas_src>
import functools
import math

import jax
import jax.numpy as jnp
from jax.experimental import pallas as pl
from jax.experimental.pallas import tpu as pltpu


def _round_up(a, b):
    return ((a + b - 1) // b) * b


# ----------------------------- Pallas kernels ------------------------------ #

def _conv_kernel(a_ref, h_ref, w_ref, b_ref, o_ref, ext_ref, *, Wc, M):
    """3x3 / stride-2 conv for one (image, row-block, Cout-tile, Cin-tile).

    a_ref  : (1, 4, M, ck)       polyphase components, output rows [r0, r0+th)
    h_ref  : (1, 4, 2*Wc, ck)    2 halo component rows (r0+th, r0+th+1)
    w_ref  : (9, ck, tn)         weights, tap-major (kh*3+kw)
    b_ref  : (1, tn)             bias
    o_ref  : (1, M, tn)          f32 output block, accumulated over the Cin axis
    ext_ref: (4, M + 2*Wc, ck)   VMEM scratch: main rows + halo stitched
    """
    k = pl.program_id(3)

    @pl.when(k == 0)
    def _init():
        # output block is resident across the K (Cin) reduction axis
        o_ref[...] = jnp.broadcast_to(b_ref[...][None], o_ref.shape)

    # Stitch the main rows and the 2 halo rows into one contiguous slab so the
    # 9 taps below are plain contiguous slices (fused im2col, VMEM only).
    ext_ref[:, :M, :] = a_ref[0]
    ext_ref[:, M:, :] = h_ref[0]

    acc = jnp.zeros(o_ref.shape[1:], jnp.float32)
    for kh in range(3):
        for kw in range(3):
            phase = (kh % 2) * 2 + (kw % 2)      # which polyphase component
            start = (kh // 2) * Wc + (kw // 2)   # flattened (row, col) offset
            tap = ext_ref[phase, pl.ds(start, M), :]          # (M, ck)
            # NOTE: could cast tap/weight to bf16 here for v6e/v7x MXU peak
            # (keep f32 accumulation); kept f32 to preserve 1e-4 tolerance.
            acc = acc + jnp.dot(tap, w_ref[kh * 3 + kw],
                                preferred_element_type=jnp.float32)
    o_ref[...] += acc[None]


def _avgpool_kernel(x_ref, p_ref, o_ref):
    """2x2 / stride-2 average pool.

    x_ref : (tb, 2, 2*Wo)  rows index (n, c, ho); middle axis = vertical pair
    p_ref : (2*Wo, Wo)     0.25 * horizontal pairing matrix
    o_ref : (tb, Wo)
    """
    v = x_ref[:, 0, :] + x_ref[:, 1, :]                     # vertical sum (VPU)
    o_ref[...] = jnp.dot(v, p_ref[...],
                         preferred_element_type=jnp.float32).astype(o_ref.dtype)


# ------------------------------ host wrappers ------------------------------ #

@jax.jit
def _conv_forward(x_nchw, weight, bias):
    N, Cin, H, W = x_nchw.shape
    Cout = weight.shape[0]
    Ho, Wo = H // 2, W // 2

    # ---- tiling / padding selection ------------------------------------- #
    Wc = _round_up(Wo + 1, 8)             # component width (8-aligned slices)
    Cout_p = _round_up(Cout, 128)         # lane-dense output stores
    tn = Cout_p if Cout_p <= 256 else 256
    Cout_p = _round_up(Cout_p, tn)
    if Cin <= 512:                        # single K step
        Cin_p, ck = Cin, Cin
    else:                                 # K-reduction grid axis + accumulator
        ck = 256
        Cin_p = _round_up(Cin, ck)
    th = 8                                # output rows per block (even)
    while th > 2 and 4 * th * Wc * ck * 4 > (4 << 20):   # keep block <~4 MiB
        th -= 2
    Ho_p = _round_up(Ho, th)
    Hc = Ho_p + 2                         # component rows incl. halo slack
    He, Wd = 2 * Hc, 2 * Wc
    M = th * Wc

    # ---- polyphase re-layout (replaces the 9x HBM im2col) ---------------- #
    xp = jnp.pad(x_nchw, ((0, 0), (0, Cin_p - Cin), (0, He - H), (0, Wd - W)))
    A = (xp.reshape(N, Cin_p, Hc, 2, Wc, 2)
           .transpose(0, 3, 5, 2, 4, 1)          # (N, 2, 2, Hc, Wc, Cin_p)
           .reshape(N, 4, Hc * Wc, Cin_p))
    w_flat = jnp.transpose(weight, (2, 3, 1, 0)).reshape(9, Cin, Cout)
    w_flat = jnp.pad(w_flat, ((0, 0), (0, Cin_p - Cin), (0, Cout_p - Cout)))
    b2 = jnp.pad(bias, (0, Cout_p - Cout)).reshape(1, Cout_p)

    grid = (N, Ho_p // th, Cout_p // tn, Cin_p // ck)
    out = pl.pallas_call(
        functools.partial(_conv_kernel, Wc=Wc, M=M),
        out_shape=jax.ShapeDtypeStruct((N, Ho_p * Wc, Cout_p), jnp.float32),
        grid_spec=pltpu.PrefetchScalarGridSpec(
            num_scalar_prefetch=0,
            grid=grid,
            in_specs=[
                pl.BlockSpec((1, 4, M, ck),
                             lambda n, i, j, k: (n, 0, i, k)),
                pl.BlockSpec((1, 4, 2 * Wc, ck),
                             lambda n, i, j, k: (n, 0, (i + 1) * (th // 2), k)),
                pl.BlockSpec((9, ck, tn), lambda n, i, j, k: (0, k, j)),
                pl.BlockSpec((1, tn), lambda n, i, j, k: (0, j)),
            ],
            out_specs=pl.BlockSpec((1, M, tn), lambda n, i, j, k: (n, i, j)),
            scratch_shapes=[pltpu.VMEM((4, M + 2 * Wc, ck), jnp.float32)],
        ),
        compiler_params=pltpu.CompilerParams(
            dimension_semantics=("parallel", "parallel", "parallel", "arbitrary"),
            vmem_limit_bytes=32 * 1024 * 1024,
        ),
    )(A, A, w_flat, b2)

    y = out.reshape(N, Ho_p, Wc, Cout_p)[:, :Ho, :Wo, :Cout]
    return jnp.transpose(y, (0, 3, 1, 2))                   # back to NCHW


@jax.jit
def _avgpool_forward(x_nchw):
    N, C, H, W = x_nchw.shape
    Ho, Wo = H // 2, W // 2
    rows = N * C * Ho
    # Free re-layout: (N,C,2Ho,2Wo) -> (rows, 2, 2*Wo).  No transposes, no
    # stacked 4-view copy in HBM.
    xr = x_nchw[:, :, :2 * Ho, :2 * Wo].reshape(rows, 2, 2 * Wo)
    pair = 0.25 * (jnp.arange(2 * Wo)[:, None] // 2
                   == jnp.arange(Wo)[None, :]).astype(jnp.float32)
    tb = min(256, _round_up(rows, 8))
    out = pl.pallas_call(
        _avgpool_kernel,
        out_shape=jax.ShapeDtypeStruct((rows, Wo), jnp.float32),
        grid=(pl.cdiv(rows, tb),),
        in_specs=[
            pl.BlockSpec((tb, 2, 2 * Wo), lambda i: (i, 0, 0)),
            pl.BlockSpec((2 * Wo, Wo), lambda i: (0, 0)),
        ],
        out_specs=pl.BlockSpec((tb, Wo), lambda i: (i, 0)),
        compiler_params=pltpu.CompilerParams(
            dimension_semantics=("parallel",),
            vmem_limit_bytes=32 * 1024 * 1024,
        ),
    )(xr, pair)
    return out.reshape(N, C, Ho, Wo)


class DownsampleppPallas:
    """JAX/Pallas port of Downsamplepp (forward semantics match PyTorch NCHW)."""

    def __init__(self, in_ch=None, out_ch=None, with_conv=False, key=None):
        out_ch = out_ch if out_ch else in_ch
        self.with_conv = with_conv
        self.out_ch = out_ch
        self.in_ch = in_ch
        if with_conv:
            if key is None:
                key = jax.random.PRNGKey(0)
            # default_init(1.0): fan_avg / uniform, same as the PyTorch module
            shape = (out_ch, in_ch, 3, 3)          # OIHW, like nn.Conv2d
            fan_in, fan_out = in_ch * 9, out_ch * 9
            variance = 1.0 / ((fan_in + fan_out) / 2.0)
            limit = math.sqrt(3.0 * variance)
            self.weight = jax.random.uniform(
                key, shape, jnp.float32, minval=-limit, maxval=limit)
            self.bias = jnp.zeros((out_ch,), jnp.float32)

    def __call__(self, x_nchw):
        x_nchw = x_nchw.astype(jnp.float32)
        if self.with_conv:
            return _conv_forward(x_nchw, self.weight, self.bias)
        return _avgpool_forward(x_nchw)


# --------------------------------- checks ---------------------------------- #

def _ref_conv(x_nchw, weight, bias):
    y = jax.lax.conv_general_dilated(
        x_nchw, weight, window_strides=(2, 2),
        padding=((0, 1), (0, 1)),
        dimension_numbers=("NCHW", "OIHW", "NCHW"))
    return y + bias[None, :, None, None]


def _ref_avgpool(x_nchw):
    N, C, H, W = x_nchw.shape
    return x_nchw.reshape(N, C, H // 2, 2, W // 2, 2).mean(axis=(3, 5))


if __name__ == "__main__":
    key = jax.random.PRNGKey(0)
    kx, kw = jax.random.split(key)
    N, C, H, W = 2, 4, 16, 16
    x = jax.random.normal(kx, (N, C, H, W), jnp.float32)

    # with_conv=True branch (3x3 stride-2 conv with asymmetric pad)
    mod_conv = DownsampleppPallas(in_ch=C, out_ch=C, with_conv=True, key=kw)
    y_conv = jax.block_until_ready(mod_conv(x))
    y_conv_ref = _ref_conv(x, mod_conv.weight, mod_conv.bias)
    assert y_conv.shape == (N, C, H // 2, W // 2), y_conv.shape
    assert jnp.allclose(y_conv, y_conv_ref, atol=1e-4, rtol=1e-4), float(
        jnp.max(jnp.abs(y_conv - y_conv_ref)))

    # with_conv=False branch (2x2 avg-pool, stride 2)
    mod_pool = DownsampleppPallas(in_ch=C, with_conv=False)
    y_pool = jax.block_until_ready(mod_pool(x))
    y_pool_ref = _ref_avgpool(x)
    assert y_pool.shape == (N, C, H // 2, W // 2), y_pool.shape
    assert jnp.allclose(y_pool, y_pool_ref, atol=1e-5, rtol=1e-5)

    print("KERNEL_OK")
</pallas_src>

<mosaic_0001>
module attributes {stable_mosaic.version = 11 : i64} {
  func.func @_conv_kernel(%arg0: i32, %arg1: i32, %arg2: i32, %arg3: i32, %arg4: memref<1x4x128x4xf32, #tpu.memory_space<vmem>>, %arg5: memref<1x4x32x4xf32, #tpu.memory_space<vmem>>, %arg6: memref<9x4x128xf32, #tpu.memory_space<vmem>>, %arg7: memref<1x128xf32, #tpu.memory_space<vmem>>, %arg8: memref<1x128x128xf32, #tpu.memory_space<vmem>>, %arg9: memref<4x160x4xf32, #tpu.memory_space<vmem>>) attributes {dimension_semantics = [#tpu.dimension_semantics<parallel>, #tpu.dimension_semantics<parallel>, #tpu.dimension_semantics<parallel>, #tpu.dimension_semantics<arbitrary>], iteration_bounds = array<i64: 2, 1, 1, 1>, scalar_prefetch = 0 : i64, scratch_operands = 1 : i64, tpu.core_type = #tpu.core_type<tc>, window_params = [{transform_indices = @transform_0, window_bounds = array<i64: 1, 4, 128, 4>}, {transform_indices = @transform_1, window_bounds = array<i64: 1, 4, 32, 4>}, {transform_indices = @transform_2, window_bounds = array<i64: 9, 4, 128>}, {transform_indices = @transform_3, window_bounds = array<i64: 1, 128>}, {transform_indices = @transform_4, window_bounds = array<i64: 1, 128, 128>}]} {
    %c0_i32 = arith.constant 0 : i32
    %0 = arith.cmpi eq, %arg3, %c0_i32 : i32
    %1 = arith.extui %0 : i1 to i32
    %c0_i32_0 = arith.constant 0 : i32
    %2 = arith.cmpi ne, %1, %c0_i32_0 : i32
    scf.if %2 {
      %c0_72 = arith.constant 0 : index
      %c0_73 = arith.constant 0 : index
      %68 = vector.load %arg7[%c0_72, %c0_73] : memref<1x128xf32, #tpu.memory_space<vmem>>, vector<1x128xf32>
      %69 = vector.shape_cast %68 : vector<1x128xf32> to vector<1x1x128xf32>
      %70 = vector.shape_cast %69 : vector<1x1x128xf32> to vector<1x1x128xf32>
      %71 = vector.broadcast %70 : vector<1x1x128xf32> to vector<1x128x128xf32>
      %c0_74 = arith.constant 0 : index
      %c0_75 = arith.constant 0 : index
      %c0_76 = arith.constant 0 : index
      %72 = vector.load %arg8[%c0_74, %c0_75, %c0_76] : memref<1x128x128xf32, #tpu.memory_space<vmem>>, vector<1x128x128xf32>
      tpu.vector_store %arg8[%c0_74, %c0_75, %c0_76], %71 {strides = array<i32>} : memref<1x128x128xf32, #tpu.memory_space<vmem>>, vector<1x128x128xf32>,
    } else {
    }
    %c0 = arith.constant 0 : index
    %c0_1 = arith.constant 0 : index
    %c0_2 = arith.constant 0 : index
    %c0_3 = arith.constant 0 : index
    %3 = vector.load %arg4[%c0, %c0_1, %c0_2, %c0_3] : memref<1x4x128x4xf32, #tpu.memory_space<vmem>>, vector<1x4x128x4xf32>
    %4 = vector.shape_cast %3 : vector<1x4x128x4xf32> to vector<4x128x4xf32>
    %c0_4 = arith.constant 0 : index
    %c0_5 = arith.constant 0 : index
    %c0_6 = arith.constant 0 : index
    %5 = vector.load %arg9[%c0_4, %c0_5, %c0_6] : memref<4x160x4xf32, #tpu.memory_space<vmem>>, vector<4x128x4xf32>
    tpu.vector_store %arg9[%c0_4, %c0_5, %c0_6], %4 {strides = array<i32>} : memref<4x160x4xf32, #tpu.memory_space<vmem>>, vector<4x128x4xf32>,
    %c0_7 = arith.constant 0 : index
    %c0_8 = arith.constant 0 : index
    %c0_9 = arith.constant 0 : index
    %c0_10 = arith.constant 0 : index
    %6 = vector.load %arg5[%c0_7, %c0_8, %c0_9, %c0_10] : memref<1x4x32x4xf32, #tpu.memory_space<vmem>>, vector<1x4x32x4xf32>
    %7 = vector.shape_cast %6 : vector<1x4x32x4xf32> to vector<4x32x4xf32>
    %c0_11 = arith.constant 0 : index
    %c128 = arith.constant 128 : index
    %c0_12 = arith.constant 0 : index
    %8 = vector.load %arg9[%c0_11, %c128, %c0_12] : memref<4x160x4xf32, #tpu.memory_space<vmem>>, vector<4x32x4xf32>
    tpu.vector_store %arg9[%c0_11, %c128, %c0_12], %7 {strides = array<i32>} : memref<4x160x4xf32, #tpu.memory_space<vmem>>, vector<4x32x4xf32>,
    %cst = arith.constant 0.000000e+00 : f32
    %9 = vector.broadcast %cst : f32 to vector<128x128xf32>
    %c0_13 = arith.constant 0 : index
    %c0_14 = arith.constant 0 : index
    %c0_15 = arith.constant 0 : index
    %10 = vector.load %arg9[%c0_13, %c0_14, %c0_15] : memref<4x160x4xf32, #tpu.memory_space<vmem>>, vector<1x128x4xf32>
    %11 = vector.shape_cast %10 : vector<1x128x4xf32> to vector<128x4xf32>
    %c0_16 = arith.constant 0 : index
    %c0_17 = arith.constant 0 : index
    %c0_18 = arith.constant 0 : index
    %12 = vector.load %arg6[%c0_16, %c0_17, %c0_18] : memref<9x4x128xf32, #tpu.memory_space<vmem>>, vector<1x4x128xf32>
    %13 = vector.shape_cast %12 : vector<1x4x128xf32> to vector<4x128xf32>
    %cst_19 = arith.constant dense<0.000000e+00> : vector<128x128xf32>
    %14 = tpu.matmul %11, %13, %cst_19 {dimension_numbers = #tpu.dot_dimension_numbers<[1], [0], [0], [1], [0, 0, 1, 1], [], []>} : vector<128x4xf32>, vector<4x128xf32>, vector<128x128xf32> -> vector<128x128xf32>
    %15 = arith.addf %9, %14 : vector<128x128xf32>
    %c1 = arith.constant 1 : index
    %c0_20 = arith.constant 0 : index
    %c0_21 = arith.constant 0 : index
    %16 = vector.load %arg9[%c1, %c0_20, %c0_21] : memref<4x160x4xf32, #tpu.memory_space<vmem>>, vector<1x128x4xf32>
    %17 = vector.shape_cast %16 : vector<1x128x4xf32> to vector<128x4xf32>
    %c1_22 = arith.constant 1 : index
    %c0_23 = arith.constant 0 : index
    %c0_24 = arith.constant 0 : index
    %18 = vector.load %arg6[%c1_22, %c0_23, %c0_24] : memref<9x4x128xf32, #tpu.memory_space<vmem>>, vector<1x4x128xf32>
    %19 = vector.shape_cast %18 : vector<1x4x128xf32> to vector<4x128xf32>
    %cst_25 = arith.constant dense<0.000000e+00> : vector<128x128xf32>
    %20 = tpu.matmul %17, %19, %cst_25 {dimension_numbers = #tpu.dot_dimension_numbers<[1], [0], [0], [1], [0, 0, 1, 1], [], []>} : vector<128x4xf32>, vector<4x128xf32>, vector<128x128xf32> -> vector<128x128xf32>
    %21 = arith.addf %15, %20 : vector<128x128xf32>
    %c0_26 = arith.constant 0 : index
    %c1_27 = arith.constant 1 : index
    %c0_28 = arith.constant 0 : index
    %22 = vector.load %arg9[%c0_26, %c1_27, %c0_28] : memref<4x160x4xf32, #tpu.memory_space<vmem>>, vector<1x128x4xf32>
    %23 = vector.shape_cast %22 : vector<1x128x4xf32> to vector<128x4xf32>
    %c2 = arith.constant 2 : index
    %c0_29 = arith.constant 0 : index
    %c0_30 = arith.constant 0 : index
    %24 = vector.load %arg6[%c2, %c0_29, %c0_30] : memref<9x4x128xf32, #tpu.memory_space<vmem>>, vector<1x4x128xf32>
    %25 = vector.shape_cast %24 : vector<1x4x128xf32> to vector<4x128xf32>
    %cst_31 = arith.constant dense<0.000000e+00> : vector<128x128xf32>
    %26 = tpu.matmul %23, %25, %cst_31 {dimension_numbers = #tpu.dot_dimension_numbers<[1], [0], [0], [1], [0, 0, 1, 1], [], []>} : vector<128x4xf32>, vector<4x128xf32>, vector<128x128xf32> -> vector<128x128xf32>
    %27 = arith.addf %21, %26 : vector<128x128xf32>
    %c2_32 = arith.constant 2 : index
    %c0_33 = arith.constant 0 : index
    %c0_34 = arith.constant 0 : index
    %28 = vector.load %arg9[%c2_32, %c0_33, %c0_34] : memref<4x160x4xf32, #tpu.memory_space<vmem>>, vector<1x128x4xf32>
    %29 = vector.shape_cast %28 : vector<1x128x4xf32> to vector<128x4xf32>
    %c3 = arith.constant 3 : index
    %c0_35 = arith.constant 0 : index
    %c0_36 = arith.constant 0 : index
    %30 = vector.load %arg6[%c3, %c0_35, %c0_36] : memref<9x4x128xf32, #tpu.memory_space<vmem>>, vector<1x4x128xf32>
    %31 = vector.shape_cast %30 : vector<1x4x128xf32> to vector<4x128xf32>
    %cst_37 = arith.constant dense<0.000000e+00> : vector<128x128xf32>
    %32 = tpu.matmul %29, %31, %cst_37 {dimension_numbers = #tpu.dot_dimension_numbers<[1], [0], [0], [1], [0, 0, 1, 1], [], []>} : vector<128x4xf32>, vector<4x128xf32>, vector<128x128xf32> -> vector<128x128xf32>
    %33 = arith.addf %27, %32 : vector<128x128xf32>
    %c3_38 = arith.constant 3 : index
    %c0_39 = arith.constant 0 : index
    %c0_40 = arith.constant 0 : index
    %34 = vector.load %arg9[%c3_38, %c0_39, %c0_40] : memref<4x160x4xf32, #tpu.memory_space<vmem>>, vector<1x128x4xf32>
    %35 = vector.shape_cast %34 : vector<1x128x4xf32> to vector<128x4xf32>
    %c4 = arith.constant 4 : index
    %c0_41 = arith.constant 0 : index
    %c0_42 = arith.constant 0 : index
    %36 = vector.load %arg6[%c4, %c0_41, %c0_42] : memref<9x4x128xf32, #tpu.memory_space<vmem>>, vector<1x4x128xf32>
    %37 = vector.shape_cast %36 : vector<1x4x128xf32> to vector<4x128xf32>
    %cst_43 = arith.constant dense<0.000000e+00> : vector<128x128xf32>
    %38 = tpu.matmul %35, %37, %cst_43 {dimension_numbers = #tpu.dot_dimension_numbers<[1], [0], [0], [1], [0, 0, 1, 1], [], []>} : vector<128x4xf32>, vector<4x128xf32>, vector<128x128xf32> -> vector<128x128xf32>
    %39 = arith.addf %33, %38 : vector<128x128xf32>
    %c2_44 = arith.constant 2 : index
    %c1_45 = arith.constant 1 : index
    %c0_46 = arith.constant 0 : index
    %40 = vector.load %arg9[%c2_44, %c1_45, %c0_46] : memref<4x160x4xf32, #tpu.memory_space<vmem>>, vector<1x128x4xf32>
    %41 = vector.shape_cast %40 : vector<1x128x4xf32> to vector<128x4xf32>
    %c5 = arith.constant 5 : index
    %c0_47 = arith.constant 0 : index
    %c0_48 = arith.constant 0 : index
    %42 = vector.load %arg6[%c5, %c0_47, %c0_48] : memref<9x4x128xf32, #tpu.memory_space<vmem>>, vector<1x4x128xf32>
    %43 = vector.shape_cast %42 : vector<1x4x128xf32> to vector<4x128xf32>
    %cst_49 = arith.constant dense<0.000000e+00> : vector<128x128xf32>
    %44 = tpu.matmul %41, %43, %cst_49 {dimension_numbers = #tpu.dot_dimension_numbers<[1], [0], [0], [1], [0, 0, 1, 1], [], []>} : vector<128x4xf32>, vector<4x128xf32>, vector<128x128xf32> -> vector<128x128xf32>
    %45 = arith.addf %39, %44 : vector<128x128xf32>
    %c0_50 = arith.constant 0 : index
    %c16 = arith.constant 16 : index
    %c0_51 = arith.constant 0 : index
    %46 = vector.load %arg9[%c0_50, %c16, %c0_51] : memref<4x160x4xf32, #tpu.memory_space<vmem>>, vector<1x128x4xf32>
    %47 = vector.shape_cast %46 : vector<1x128x4xf32> to vector<128x4xf32>
    %c6 = arith.constant 6 : index
    %c0_52 = arith.constant 0 : index
    %c0_53 = arith.constant 0 : index
    %48 = vector.load %arg6[%c6, %c0_52, %c0_53] : memref<9x4x128xf32, #tpu.memory_space<vmem>>, vector<1x4x128xf32>
    %49 = vector.shape_cast %48 : vector<1x4x128xf32> to vector<4x128xf32>
    %cst_54 = arith.constant dense<0.000000e+00> : vector<128x128xf32>
    %50 = tpu.matmul %47, %49, %cst_54 {dimension_numbers = #tpu.dot_dimension_numbers<[1], [0], [0], [1], [0, 0, 1, 1], [], []>} : vector<128x4xf32>, vector<4x128xf32>, vector<128x128xf32> -> vector<128x128xf32>
    %51 = arith.addf %45, %50 : vector<128x128xf32>
    %c1_55 = arith.constant 1 : index
    %c16_56 = arith.constant 16 : index
    %c0_57 = arith.constant 0 : index
    %52 = vector.load %arg9[%c1_55, %c16_56, %c0_57] : memref<4x160x4xf32, #tpu.memory_space<vmem>>, vector<1x128x4xf32>
    %53 = vector.shape_cast %52 : vector<1x128x4xf32> to vector<128x4xf32>
    %c7 = arith.constant 7 : index
    %c0_58 = arith.constant 0 : index
    %c0_59 = arith.constant 0 : index
    %54 = vector.load %arg6[%c7, %c0_58, %c0_59] : memref<9x4x128xf32, #tpu.memory_space<vmem>>, vector<1x4x128xf32>
    %55 = vector.shape_cast %54 : vector<1x4x128xf32> to vector<4x128xf32>
    %cst_60 = arith.constant dense<0.000000e+00> : vector<128x128xf32>
    %56 = tpu.matmul %53, %55, %cst_60 {dimension_numbers = #tpu.dot_dimension_numbers<[1], [0], [0], [1], [0, 0, 1, 1], [], []>} : vector<128x4xf32>, vector<4x128xf32>, vector<128x128xf32> -> vector<128x128xf32>
    %57 = arith.addf %51, %56 : vector<128x128xf32>
    %c0_61 = arith.constant 0 : index
    %c17 = arith.constant 17 : index
    %c0_62 = arith.constant 0 : index
    %58 = vector.load %arg9[%c0_61, %c17, %c0_62] : memref<4x160x4xf32, #tpu.memory_space<vmem>>, vector<1x128x4xf32>
    %59 = vector.shape_cast %58 : vector<1x128x4xf32> to vector<128x4xf32>
    %c8 = arith.constant 8 : index
    %c0_63 = arith.constant 0 : index
    %c0_64 = arith.constant 0 : index
    %60 = vector.load %arg6[%c8, %c0_63, %c0_64] : memref<9x4x128xf32, #tpu.memory_space<vmem>>, vector<1x4x128xf32>
    %61 = vector.shape_cast %60 : vector<1x4x128xf32> to vector<4x128xf32>
    %cst_65 = arith.constant dense<0.000000e+00> : vector<128x128xf32>
    %62 = tpu.matmul %59, %61, %cst_65 {dimension_numbers = #tpu.dot_dimension_numbers<[1], [0], [0], [1], [0, 0, 1, 1], [], []>} : vector<128x4xf32>, vector<4x128xf32>, vector<128x128xf32> -> vector<128x128xf32>
    %63 = arith.addf %57, %62 : vector<128x128xf32>
    %c0_66 = arith.constant 0 : index
    %c0_67 = arith.constant 0 : index
    %c0_68 = arith.constant 0 : index
    %64 = vector.load %arg8[%c0_66, %c0_67, %c0_68] : memref<1x128x128xf32, #tpu.memory_space<vmem>>, vector<1x128x128xf32>
    %65 = vector.shape_cast %63 : vector<128x128xf32> to vector<1x128x128xf32>
    %66 = arith.addf %64, %65 : vector<1x128x128xf32>
    %c0_69 = arith.constant 0 : index
    %c0_70 = arith.constant 0 : index
    %c0_71 = arith.constant 0 : index
    %67 = vector.load %arg8[%c0_69, %c0_70, %c0_71] : memref<1x128x128xf32, #tpu.memory_space<vmem>>, vector<1x128x128xf32>
    tpu.vector_store %arg8[%c0_69, %c0_70, %c0_71], %66 {strides = array<i32>} : memref<1x128x128xf32, #tpu.memory_space<vmem>>, vector<1x128x128xf32>,
    return
  }
  func.func @transform_0(%arg0: i32, %arg1: i32, %arg2: i32, %arg3: i32) -> (i32, i32, i32, i32) {
    %c0_i32 = arith.constant 0 : i32
    %c0_i32_0 = arith.constant 0 : i32
    return %arg0, %c0_i32, %arg1, %arg3 : i32, i32, i32, i32
  }
  func.func @transform_1(%arg0: i32, %arg1: i32, %arg2: i32, %arg3: i32) -> (i32, i32, i32, i32) {
    %c1_i32 = arith.constant 1 : i32
    %0 = arith.addi %arg1, %c1_i32 : i32
    %c4_i32 = arith.constant 4 : i32
    %1 = arith.muli %0, %c4_i32 : i32
    %c0_i32 = arith.constant 0 : i32
    %c0_i32_0 = arith.constant 0 : i32
    return %arg0, %c0_i32, %1, %arg3 : i32, i32, i32, i32
  }
  func.func @transform_2(%arg0: i32, %arg1: i32, %arg2: i32, %arg3: i32) -> (i32, i32, i32) {
    %c0_i32 = arith.constant 0 : i32
    %c0_i32_0 = arith.constant 0 : i32
    return %c0_i32, %arg3, %arg2 : i32, i32, i32
  }
  func.func @transform_3(%arg0: i32, %arg1: i32, %arg2: i32, %arg3: i32) -> (i32, i32) {
    %c0_i32 = arith.constant 0 : i32
    %c0_i32_0 = arith.constant 0 : i32
    return %c0_i32, %arg2 : i32, i32
  }
  func.func @transform_4(%arg0: i32, %arg1: i32, %arg2: i32, %arg3: i32) -> (i32, i32, i32) {
    %c0_i32 = arith.constant 0 : i32
    return %arg0, %arg1, %arg2 : i32, i32, i32
  }
}

</mosaic_0001>

<bundles_post_ra>
// kernel: _conv_forward.1
= control target key start
LH: loop header
LB: loop body
LE: loop exit
PB: predicated region body
PF: predicated region fallthrough
CT: control target
= control target key end

     0   :  { %s2814_s15 = smov 0   ;;  %s2816_s16 = smov 0   ;;  %s3645_s0 = inlined_call_operand.vmem [shape: f32[2,4,160,4], index: 0, kind: input, shape index: {}, may-alias: {0,1}]   ;;  %s3646_s1 = inlined_call_operand.vmem [shape: f32[2,4,160,4], index: 1, kind: input, shape index: {}, may-alias: {0,1}]   ;;  %s3647_s2 = inlined_call_operand.vmem [shape: f32[9,4,128], index: 2, kind: input, shape index: {}]   ;;  %s3648_s3 = inlined_call_operand.vmem [shape: f32[1,128], index: 3, kind: input, shape index: {}]   ;;  %s3649_s4 = inlined_call_operand.vmem [shape: f32[2,128,128], index: 4, kind: output, shape index: {}]  }
   0x1   :  { %s2818_s17 = smov 0   ;;  %s2820_s18 = smov 0  }
   0x2   :  { %s2822_s19 = smov 0  }
   0x3 LB: > { %s40_s20 = sadd.s32 1, %s2767_s18  ;;  %p58_p1 = scmp.ne.s32.totalorder %s2759_s16, %s2755_s15  ;;  %s2771_s19 = sphi %s2822_s19, %s14_s19   ;;  %s2767_s18 = sphi %s2820_s18, %s3671_s18   ;;  %s2763_s17 = sphi %s2818_s17, %s3670_s17   ;;  %s2759_s16 = sphi %s2816_s16, %s3669_s16   ;;  %s2755_s15 = sphi %s2814_s15, %s3668_s15  }
   0x4   : > { %p42_p0 = scmp.ge.s32.totalorder %s40_s20, 2  ;;  %p59_p2 = scmp.eq.s32.totalorder %s2771_s19, 0 }
   0x5   : > { %s51_s23 = sadd.s32 1, %s2759_s16  ;;  %p2442_p5 = scmp.ge.s32.totalorder %s2771_s19, 2 }
   0x6   : > { %s3673_s20 = smov (%p42_p0, %s40_s20), 0  ;;  %p2845_p3 = por %p59_p2, %p58_p1 }
   0x7   : > { %s44_s22 = ssub.s32 %s2767_s18, %s3673_s20  ;;  %218 = sbr.rel (%p2442_p5) target bundleno = 71 (0x47), region = 24 }
   0x8   : > { %p49_p4 = scmp.eq.s32.totalorder %s44_s22, 0 }
   0xa   : > { %s2853_s24 = scalar_select %p49_p4, %s2759_s16, %s51_s23  }
   0xc   : > { %221 = sbr.rel (!%p2845_p3) target bundleno = 50 (0x32), region = 28  ;;  %s223_s25 = sand.u32 (%p2845_p3), 1, %s2759_s16  }
   0xd   : > { %s2643_s26 = smul.u32 (%p2845_p3), 640, %s2767_s18  ;;  %s2860_s27 = sshll.u32 (%p2845_p3), %s223_s25, 9 }
   0xe   : > { %s225_s5 = scalar_lea.vmem (%p2845_p3), [#allocation3], %s2860_s27   ;;  %s2875_s8 = smov (%p2845_p3), 0  }
   0xf   : > { %s2865_s30 = scalar_lea.vmem (%p2845_p3), %s3645_s0, %s2643_s26   ;;  %s3653_s6 = smov (%p2845_p3), %s225_s5 }
  0x10   : > { %s3654_s7 = smov (%p2845_p3), %s2865_s30  ;;  %s2877_s9 = smov (%p2845_p3), 0  }
  0x11 LB: >> { %v370_v0 = vld [vmem:[%s2779_s7] sm:$0xff]  ;;  %v372_v1 = vld [vmem:[%s2779_s7 + $0x8] sm:$0xff]  ;;  %v374_v2 = vld [vmem:[%s2779_s7 + $0x10] sm:$0xff]  ;;  %s434_s10 = sadd.s32 1, %s2783_s8  ;;  %s364_s9 = sadd.s32 1, %s2787_s9   ;;  %s2787_s9 = sphi %s2877_s9, %s364_s9   ;;  %s2783_s8 = sphi %s2875_s8, %s3657_s8   ;;  %s2779_s7 = sphi %s3654_s7, %s3656_s7   ;;  %s2775_s6 = sphi %s3653_s6, %s3655_s6  }
  0x12   : >> { %371 = vst [vmem:[%s2775_s6] sm:$0xff] %v370_v0  ;;  %v376_v3 = vld [vmem:[%s2779_s7 + $0x18] sm:$0xff]  ;;  %p435_p6 = scmp.ge.s32.totalorder %s434_s10, 2  ;;  %v378_v4 = vld [vmem:[%s2779_s7 + $0x20] sm:$0xff]  ;;  %v380_v5 = vld [vmem:[%s2779_s7 + $0x28] sm:$0xff]  ;;  %p363_p7 = scmp.ge.s32.totalorder %s364_s9, 2 }
  0x13   : >> { %373 = vst [vmem:[%s2775_s6 + $0x8] sm:$0xff] %v372_v1  ;;  %v382_v6 = vld [vmem:[%s2779_s7 + $0x30] sm:$0xff]  ;;  %v384_v7 = vld [vmem:[%s2779_s7 + $0x38] sm:$0xff]  ;;  %v386_v8 = vld [vmem:[%s2779_s7 + $0xa0] sm:$0xff] }
  0x14   : >> { %375 = vst [vmem:[%s2775_s6 + $0x10] sm:$0xff] %v374_v2  ;;  %s3675_s10 = smov (%p435_p6, %s434_s10), 0  ;;  %v388_v9 = vld [vmem:[%s2779_s7 + $0xa8] sm:$0xff]  ;;  %v390_v10 = vld [vmem:[%s2779_s7 + $0xb0] sm:$0xff]  ;;  %v392_v11 = vld [vmem:[%s2779_s7 + $0xb8] sm:$0xff] }
  0x15   : >> { %377 = vst [vmem:[%s2775_s6 + $0x18] sm:$0xff] %v376_v3  ;;  %s2445_s11 = sshll.u32 %s3675_s10, 6  ;;  %v394_v12 = vld [vmem:[%s2779_s7 + $0xc0] sm:$0xff]  ;;  %v396_v13 = vld [vmem:[%s2779_s7 + $0xc8] sm:$0xff]  ;;  %v398_v14 = vld [vmem:[%s2779_s7 + $0xd0] sm:$0xff]  ;;  %s3657_s8 = smov %s3675_s10 }
  0x16   : >> { %379 = vst [vmem:[%s2775_s6 + $0x20] sm:$0xff] %v378_v4  ;;  %s2908_s12 = scalar_lea.vmem %s2865_s30, %s2445_s11   ;;  %s2912_s13 = scalar_lea.vmem %s225_s5, %s2445_s11 [#allocation3]   ;;  %v400_v15 = vld [vmem:[%s2779_s7 + $0xd8] sm:$0xff]  ;;  %v402_v16 = vld [vmem:[%s2779_s7 + $0x140] sm:$0xff]  ;;  %v404_v17 = vld [vmem:[%s2779_s7 + $0x148] sm:$0xff] }
  0x17   : >> { %381 = vst [vmem:[%s2775_s6 + $0x28] sm:$0xff] %v380_v5  ;;  %v406_v18 = vld [vmem:[%s2779_s7 + $0x150] sm:$0xff]  ;;  %v408_v19 = vld [vmem:[%s2779_s7 + $0x158] sm:$0xff]  ;;  %v410_v20 = vld [vmem:[%s2779_s7 + $0x160] sm:$0xff] }
  0x18   : >> { %383 = vst [vmem:[%s2775_s6 + $0x30] sm:$0xff] %v382_v6  ;;  %v412_v21 = vld [vmem:[%s2779_s7 + $0x168] sm:$0xff]  ;;  %v414_v22 = vld [vmem:[%s2779_s7 + $0x170] sm:$0xff]  ;;  %v416_v23 = vld [vmem:[%s2779_s7 + $0x178] sm:$0xff] }
  0x19   : >> { %385 = vst [vmem:[%s2775_s6 + $0x38] sm:$0xff] %v384_v7  ;;  %v418_v24 = vld [vmem:[%s2779_s7 + $0x1e0] sm:$0xff]  ;;  %v420_v25 = vld [vmem:[%s2779_s7 + $0x1e8] sm:$0xff]  ;;  %v422_v26 = vld [vmem:[%s2779_s7 + $0x1f0] sm:$0xff] }
  0x1a   : >> { %387 = vst [vmem:[%s2775_s6 + $0x80] sm:$0xff] %v386_v8  ;;  %v424_v27 = vld [vmem:[%s2779_s7 + $0x1f8] sm:$0xff]  ;;  %v426_v28 = vld [vmem:[%s2779_s7 + $0x200] sm:$0xff]  ;;  %v428_v29 = vld [vmem:[%s2779_s7 + $0x208] sm:$0xff] }
  0x1b   : >> { %389 = vst [vmem:[%s2775_s6 + $0x88] sm:$0xff] %v388_v9  ;;  %v430_v30 = vld [vmem:[%s2779_s7 + $0x210] sm:$0xff]  ;;  %v432_v31 = vld [vmem:[%s2779_s7 + $0x218] sm:$0xff]  ;;  %s3656_s7 = smov %s2908_s12 }
  0x1c   : >> { %391 = vst [vmem:[%s2775_s6 + $0x90] sm:$0xff] %v390_v10 }
  0x1d   : >> { %393 = vst [vmem:[%s2775_s6 + $0x98] sm:$0xff] %v392_v11 }
  0x1e   : >> { %395 = vst [vmem:[%s2775_s6 + $0xa0] sm:$0xff] %v394_v12 }
  0x1f   : >> { %397 = vst [vmem:[%s2775_s6 + $0xa8] sm:$0xff] %v396_v13 }
  0x20   : >> { %399 = vst [vmem:[%s2775_s6 + $0xb0] sm:$0xff] %v398_v14 }
  0x21   : >> { %401 = vst [vmem:[%s2775_s6 + $0xb8] sm:$0xff] %v400_v15 }
  0x22   : >> { %403 = vst [vmem:[%s2775_s6 + $0x100] sm:$0xff] %v402_v16 }
  0x23   : >> { %405 = vst [vmem:[%s2775_s6 + $0x108] sm:$0xff] %v404_v17 }
  0x24   : >> { %407 = vst [vmem:[%s2775_s6 + $0x110] sm:$0xff] %v406_v18 }
  0x25   : >> { %409 = vst [vmem:[%s2775_s6 + $0x118] sm:$0xff] %v408_v19 }
  0x26   : >> { %411 = vst [vmem:[%s2775_s6 + $0x120] sm:$0xff] %v410_v20 }
  0x27   : >> { %413 = vst [vmem:[%s2775_s6 + $0x128] sm:$0xff] %v412_v21 }
  0x28   : >> { %415 = vst [vmem:[%s2775_s6 + $0x130] sm:$0xff] %v414_v22 }
  0x29   : >> { %417 = vst [vmem:[%s2775_s6 + $0x138] sm:$0xff] %v416_v23 }
  0x2a   : >> { %419 = vst [vmem:[%s2775_s6 + $0x180] sm:$0xff] %v418_v24 }
  0x2b   : >> { %421 = vst [vmem:[%s2775_s6 + $0x188] sm:$0xff] %v420_v25 }
  0x2c   : >> { %423 = vst [vmem:[%s2775_s6 + $0x190] sm:$0xff] %v422_v26 }
  0x2d   : >> { %425 = vst [vmem:[%s2775_s6 + $0x198] sm:$0xff] %v424_v27  ;;  %366 = sbr.rel (!%p363_p7) target bundleno = 17 (0x11), region = 198 }
  0x2e   : >> { %427 = vst [vmem:[%s2775_s6 + $0x1a0] sm:$0xff] %v426_v28 }
  0x2f   : >> { %429 = vst [vmem:[%s2775_s6 + $0x1a8] sm:$0xff] %v428_v29 }
  0x30   : >> { %431 = vst [vmem:[%s2775_s6 + $0x1b0] sm:$0xff] %v430_v30 }
  0x31   : >> { %433 = vst [vmem:[%s2775_s6 + $0x1b8] sm:$0xff] %v432_v31  ;;  %s3655_s6 = smov %s2912_s13 }
  0x32 PF: > { %477 = sbr.rel (!%p2845_p3) target bundleno = 71 (0x47), region = 80  ;;  %s479_s14 = sand.u32 (%p2845_p3), 1, %s2759_s16  }
  0x33   : > { %s2454_s22 = smul.u32 (%p2845_p3), 640, %s2767_s18  ;;  %s2453_s23 = sshll.u32 (%p2845_p3), %s479_s14, 7 }
  0x34   : > { %s481_s21 = scalar_lea.vmem (%p2845_p3), [#allocation4], %s2453_s23 }
  0x35   : > { %s2982_s28 = scalar_lea.vmem (%p2845_p3), %s3646_s1, %s2454_s22 }
  0x36   : > { %v2455_v32 = vld [vmem:[%s2982_s28 + $0x80] sm:$0xff] (%p2845_p3)  ;;  %v2456_v33 = vld [vmem:[%s2982_s28 + $0x88] sm:$0xff] (%p2845_p3)  ;;  %v2457_v34 = vld [vmem:[%s2982_s28 + $0x90] sm:$0xff] (%p2845_p3) }
  0x37   : > { %549 = vst [vmem:[%s481_s21] sm:$0xff] %v2455_v32  ;;  %v2458_v35 = vld [vmem:[%s2982_s28 + $0x98] sm:$0xff]  ;;  %v2459_v36 = vld [vmem:[%s2982_s28 + $0x120] sm:$0xff]  ;;  %v2460_v37 = vld [vmem:[%s2982_s28 + $0x128] sm:$0xff] }
  0x38   : > { %551 = vst [vmem:[%s481_s21 + $0x8] sm:$0xff] %v2456_v33  ;;  %v2461_v38 = vld [vmem:[%s2982_s28 + $0x130] sm:$0xff]  ;;  %v2462_v39 = vld [vmem:[%s2982_s28 + $0x138] sm:$0xff]  ;;  %v2463_v40 = vld [vmem:[%s2982_s28 + $0x1c0] sm:$0xff] }
  0x39   : > { %553 = vst [vmem:[%s481_s21 + $0x10] sm:$0xff] %v2457_v34  ;;  %v2464_v41 = vld [vmem:[%s2982_s28 + $0x1c8] sm:$0xff]  ;;  %v2465_v42 = vld [vmem:[%s2982_s28 + $0x1d0] sm:$0xff]  ;;  %v2466_v43 = vld [vmem:[%s2982_s28 + $0x1d8] sm:$0xff] }
  0x3a   : > { %555 = vst [vmem:[%s481_s21 + $0x18] sm:$0xff] %v2458_v35  ;;  %v2467_v44 = vld [vmem:[%s2982_s28 + $0x260] sm:$0xff]  ;;  %v2468_v45 = vld [vmem:[%s2982_s28 + $0x268] sm:$0xff]  ;;  %v2469_v46 = vld [vmem:[%s2982_s28 + $0x270] sm:$0xff] }
  0x3b   : > { %557 = vst [vmem:[%s481_s21 + $0x20] sm:$0xff] %v2459_v36  ;;  %v2470_v47 = vld [vmem:[%s2982_s28 + $0x278] sm:$0xff] }
  0x3c   : > { %559 = vst [vmem:[%s481_s21 + $0x28] sm:$0xff] %v2460_v37 }
  0x3d   : > { %561 = vst [vmem:[%s481_s21 + $0x30] sm:$0xff] %v2461_v38 }
  0x3e   : > { %563 = vst [vmem:[%s481_s21 + $0x38] sm:$0xff] %v2462_v39 }
  0x3f   : > { %565 = vst [vmem:[%s481_s21 + $0x40] sm:$0xff] %v2463_v40 }
  0x40   : > { %567 = vst [vmem:[%s481_s21 + $0x48] sm:$0xff] %v2464_v41 }
  0x41   : > { %569 = vst [vmem:[%s481_s21 + $0x50] sm:$0xff] %v2465_v42 }
  0x42   : > { %571 = vst [vmem:[%s481_s21 + $0x58] sm:$0xff] %v2466_v43 }
  0x43   : > { %573 = vst [vmem:[%s481_s21 + $0x60] sm:$0xff] %v2467_v44 }
  0x44   : > { %575 = vst [vmem:[%s481_s21 + $0x68] sm:$0xff] %v2468_v45 }
  0x45   : > { %577 = vst [vmem:[%s481_s21 + $0x70] sm:$0xff] %v2469_v46 }
  0x46   : > { %579 = vst [vmem:[%s481_s21 + $0x78] sm:$0xff] %v2470_v47 }
  0x47 PF: > { %p2471_p8 = scmp.ge.s32.totalorder %s2771_s19, 1  ;;  %p584_p9 = scmp.lt.s32.totalorder %s2771_s19, 3 }
  0x49   : > { %p585_p10 = pnand %p2471_p8, %p584_p9 }
  0x4b   : > { %588 = sbr.rel (%p585_p10) target bundleno = 514 (0x202), region = 118 }
  0x50   : > { %v2476_v48 = vld [vmem:[%s3647_s2 + $0x4] sm:$0xf]  ;;  %vm944_vm0 = vcmask 1043456   ;;  %s591_s30 = sand.u32 1, %s2755_s15   ;;  %vm763_vm1 = vcmask 31744   ;;  %p663_p11 = scmp.lt.s32.totalorder %s2763_s17, 1 }
  0x51   : > { %2640 = vmatpush.msk.msra.mxu1 %vm944_vm0, %v2476_v48  ;;  %2641 = vmatpush.msk.msra.mxu2 %vm944_vm0, %v2476_v48  ;;  %s2472_s5 = sshll.u32 %s591_s30, 9  ;;  %v2511_v49 = vld [vmem:[%s3647_s2 + $0x8] sm:$0xf]  ;;  %v2529_v50 = vld [vmem:[%s3647_s2 + $0xc] sm:$0xf] }
  0x52   : > { %2642 = vmatpush.msk.msra.mxu3 %vm944_vm0, %v2476_v48  ;;  %v876_v51 = vld [vmem:[%s3647_s2] sm:$0xf]  ;;  %v2547_v52 = vld [vmem:[%s3647_s2 + $0x10] sm:$0xf]  ;;  %s3024_s14 = scalar_lea.vmem [#allocation3], %s2472_s5  ;;  %2477 = vmatpush.msk.msra.mxu0 %vm944_vm0, %v2476_v48  ;;  %s2473_s5 = sshll.u32 %s591_s30, 7 }
  0x53   : > { %2512 = vmatpush.msk.msrb.mxu2 %vm944_vm0, %v2511_v49  ;;  %v719_v53 = vld [vmem:[%s3024_s14 + $0xa0] sm:$0xff]  ;;  %2494 = vmatpush.msk.msrb.mxu1 %vm944_vm0, %v876_v51  ;;  %v720_v56 = vld [vmem:[%s3024_s14 + $0xa8] sm:$0xff]  ;;  %v721_v60 = vld [vmem:[%s3024_s14 + $0xb0] sm:$0xff]  ;;  %s3322_s6 = scalar_lea.vmem [#allocation4], %s2473_s5  ;;  %s3677_s17 = smov (!%p663_p11, %s2763_s17), 1 }
  0x54   : > { %v723_v54 = vld [vmem:[%s3024_s14 + $0xc0] sm:$0xff]  ;;  %2530 = vmatpush.msk.msrb.mxu3 %vm944_vm0, %v2529_v50  ;;  %784 = vst.msk [vmem:[#allocation2 + $0xc0] sm:$0xff] %vm763_vm1, %v719_v53  ;;  %v724_v57 = vld [vmem:[%s3024_s14 + $0xc8] sm:$0xff]  ;;  %2548 = vmatpush.msk.msrb.mxu0 %vm944_vm0, %v2547_v52  ;;  %v725_v61 = vld [vmem:[%s3024_s14 + $0xd0] sm:$0xff]  ;;  %s2639_s15 = sshll.u32 %s3677_s17, 7 }
  0x55   : > { %v727_v55 = vld [vmem:[%s3024_s14 + $0xe0] sm:$0xff]  ;;  %788 = vst.msk [vmem:[#allocation2 + $0xe0] sm:$0xff] %vm763_vm1, %v723_v54  ;;  %v728_v59 = vld [vmem:[%s3024_s14 + $0xe8] sm:$0xff]  ;;  %v729_v0 = vld [vmem:[%s3024_s14 + $0xf0] sm:$0xff]  ;;  %s3581_s10 = scalar_lea.vmem %s3649_s4, %s2639_s15 }
  0x56   : > { %792 = vst.msk [vmem:[#allocation2 + $0x100] sm:$0xff] %vm763_vm1, %v727_v55  ;;  %v715_v58 = vld [vmem:[%s3024_s14 + $0x80] sm:$0xff]  ;;  %v716_v62 = vld [vmem:[%s3024_s14 + $0x88] sm:$0xff]  ;;  %v722_v2 = vld [vmem:[%s3024_s14 + $0xb8] sm:$0xff] }
  0x57   : > { %785 = vst.msk [vmem:[#allocation2 + $0xc8] sm:$0xff] %vm763_vm1, %v720_v56  ;;  %v726_v4 = vld [vmem:[%s3024_s14 + $0xd8] sm:$0xff]  ;;  %v717_v6 = vld [vmem:[%s3024_s14 + $0x90] sm:$0xff]  ;;  %v699_v11 = vld [vmem:[%s3024_s14] sm:$0xff] }
  0x58   : > { %789 = vst.msk [vmem:[#allocation2 + $0xe8] sm:$0xff] %vm763_vm1, %v724_v57  ;;  %v2583_v5 = vld [vmem:[%s3647_s2 + $0x18] sm:$0xf]  ;;  %v2601_v7 = vld [vmem:[%s3647_s2 + $0x1c] sm:$0xf]  ;;  %v700_v13 = vld [vmem:[%s3024_s14 + $0x8] sm:$0xff] }
  0x59   : > { %780 = vst.msk [vmem:[#allocation2 + $0xa0] sm:$0xff] %vm763_vm1, %v715_v58  ;;  %v2565_v8 = vld [vmem:[%s3647_s2 + $0x14] sm:$0xf]  ;;  %v730_v9 = vld [vmem:[%s3024_s14 + $0xf8] sm:$0xff]  ;;  %v731_v17 = vld [vmem:[%s3024_s14 + $0x100] sm:$0xff] }
  0x5a   : > { %793 = vst.msk [vmem:[#allocation2 + $0x108] sm:$0xff] %vm763_vm1, %v728_v59  ;;  %v718_v15 = vld [vmem:[%s3024_s14 + $0x98] sm:$0xff]  ;;  %v701_v18 = vld [vmem:[%s3024_s14 + $0x10] sm:$0xff]  ;;  %v732_v19 = vld [vmem:[%s3024_s14 + $0x108] sm:$0xff] }
  0x5b   : > { %v3047_v63 = vld [vmem:[#allocation2 + $0xc0] sm:$0xff]  ;;  %786 = vst.msk [vmem:[#allocation2 + $0xd0] sm:$0xff] %vm763_vm1, %v721_v60  ;;  %v702_v23 = vld [vmem:[%s3024_s14 + $0x18] sm:$0xff]  ;;  %v733_v24 = vld [vmem:[%s3024_s14 + $0x110] sm:$0xff] }
  0x5c   : > { %2482 = vmatmul.msk.f32.vlgmr.msra.gmra.mxu1 %vm763_vm1, %v3047_v63  ;;  %v3053_v1 = vld [vmem:[#allocation2 + $0xe0] sm:$0xff]  ;;  %790 = vst.msk [vmem:[#allocation2 + $0xf0] sm:$0xff] %vm763_vm1, %v725_v61  ;;  %v748_v26 = vld [vmem:[%s3024_s14 + $0x188] sm:$0xff]  ;;  %v734_v31 = vld [vmem:[%s3024_s14 + $0x118] sm:$0xff] }
  0x5d   : > { %2486 = vmatmul.msk.f32.vlgmr.msra.gmra.mxu2 %vm763_vm1, %v3053_v1  ;;  %v3059_v3 = vld [vmem:[#allocation2 + $0x100] sm:$0xff]  ;;  %781 = vst.msk [vmem:[#allocation2 + $0xa8] sm:$0xff] %vm763_vm1, %v716_v62  ;;  %2566 = vmatpush.msk.msra.mxu1 %vm944_vm0, %v2565_v8  ;;  %v749_v32 = vld [vmem:[%s3024_s14 + $0x190] sm:$0xff]  ;;  %v704_v36 = vld [vmem:[%s3024_s14 + $0x28] sm:$0xff] }
  0x5e   : > { %2490 = vmatmul.msk.f32.vlgmr.msra.gmra.mxu3 %vm763_vm1, %v3059_v3  ;;  %794 = vst.msk [vmem:[#allocation2 + $0x110] sm:$0xff] %vm763_vm1, %v729_v0  ;;  %2584 = vmatpush.msk.msra.mxu2 %vm944_vm0, %v2583_v5  ;;  %v3083_v12 = vld [vmem:[#allocation2 + $0xc8] sm:$0xff]  ;;  %v747_v21 = vld [vmem:[%s3024_s14 + $0x180] sm:$0xff]  ;;  %v750_v39 = vld [vmem:[%s3024_s14 + $0x198] sm:$0xff] }
  0x5f   : > { %787 = vst.msk [vmem:[#allocation2 + $0xd8] sm:$0xff] %vm763_vm1, %v722_v2  ;;  %2602 = vmatpush.msk.msra.mxu3 %vm944_vm0, %v2601_v7  ;;  %v3088_v14 = vld [vmem:[#allocation2 + $0xe8] sm:$0xff]  ;;  %v2619_v22 = vld [vmem:[%s3647_s2 + $0x20] sm:$0xf]  ;;  %v705_v43 = vld [vmem:[%s3024_s14 + $0x30] sm:$0xff] }
  0x60   : > { %v878_v10 = vld [vmem:[#allocation2 + $0xa0] sm:$0xff]  ;;  %791 = vst.msk [vmem:[#allocation2 + $0xf8] sm:$0xff] %vm763_vm1, %v726_v4  ;;  %v736_v45 = vld [vmem:[%s3024_s14 + $0x128] sm:$0xff]  ;;  %v706_v50 = vld [vmem:[%s3024_s14 + $0x38] sm:$0xff] }
  0x61   : > { %2478 = vmatmul.msk.f32.vlgmr.msra.gmra.mxu0 %vm763_vm1, %v878_v10  ;;  %782 = vst.msk [vmem:[#allocation2 + $0xb0] sm:$0xff] %vm763_vm1, %v717_v6  ;;  %v3092_v16 = vld [vmem:[#allocation2 + $0x108] sm:$0xff]  ;;  %v703_v29 = vld [vmem:[%s3024_s14 + $0x20] sm:$0xff]  ;;  %v737_v52 = vld [vmem:[%s3024_s14 + $0x130] sm:$0xff] }
  0x62   : > { %795 = vst.msk [vmem:[#allocation2 + $0x118] sm:$0xff] %vm763_vm1, %v730_v9  ;;  %2620 = vmatpush.msk.msra.mxu0 %vm944_vm0, %v2619_v22  ;;  %v3116_v25 = vld [vmem:[#allocation2 + $0xd0] sm:$0xff]  ;;  %v735_v38 = vld [vmem:[%s3024_s14 + $0x120] sm:$0xff]  ;;  %v752_v53 = vld [vmem:[%s3024_s14 + $0x1a8] sm:$0xff] }
  0x63   : > { %764 = vst.msk [vmem:[#allocation2] sm:$0xff] %vm763_vm1, %v699_v11  ;;  %v3121_v27 = vld [vmem:[#allocation2 + $0xf0] sm:$0xff]  ;;  %v751_v46 = vld [vmem:[%s3024_s14 + $0x1a0] sm:$0xff]  ;;  %v738_v59 = vld [vmem:[%s3024_s14 + $0x138] sm:$0xff] }
  0x64   : > { %2483 = vmatmul.msk.f32.gmra.mxu1 %vm763_vm1, %v3083_v12  ;;  %765 = vst.msk [vmem:[#allocation2 + $0x8] sm:$0xff] %vm763_vm1, %v700_v13  ;;  %v879_v20 = vld [vmem:[#allocation2 + $0xa8] sm:$0xff]  ;;  %v707_v57 = vld [vmem:[%s3024_s14 + $0x40] sm:$0xff]  ;;  %v753_v60 = vld [vmem:[%s3024_s14 + $0x1b0] sm:$0xff] }
  0x65   : > { %2487 = vmatmul.msk.f32.gmra.mxu2 %vm763_vm1, %v3088_v14  ;;  %783 = vst.msk [vmem:[#allocation2 + $0xb8] sm:$0xff] %vm763_vm1, %v718_v15  ;;  %v3124_v28 = vld [vmem:[#allocation2 + $0x110] sm:$0xff]  ;;  %v708_v2 = vld [vmem:[%s3024_s14 + $0x48] sm:$0xff]  ;;  %v739_v5 = vld [vmem:[%s3024_s14 + $0x140] sm:$0xff] }
  0x66   : > { %2491 = vmatmul.msk.f32.gmra.mxu3 %vm763_vm1, %v3092_v16  ;;  %796 = vst.msk [vmem:[#allocation2 + $0x140] sm:$0xff] %vm763_vm1, %v731_v17  ;;  %v3142_v33 = vld [vmem:[#allocation2 + $0xd8] sm:$0xff]  ;;  %v709_v10 = vld [vmem:[%s3024_s14 + $0x50] sm:$0xff]  ;;  %v740_v13 = vld [vmem:[%s3024_s14 + $0x148] sm:$0xff] }
  0x67   : > { %766 = vst.msk [vmem:[#allocation2 + $0x10] sm:$0xff] %vm763_vm1, %v701_v18  ;;  %v3146_v34 = vld [vmem:[#allocation2 + $0xf8] sm:$0xff]  ;;  %v755_v15 = vld [vmem:[%s3024_s14 + $0x1c0] sm:$0xff]  ;;  %v741_v22 = vld [vmem:[%s3024_s14 + $0x150] sm:$0xff] }
  0x68   : > { %797 = vst.msk [vmem:[#allocation2 + $0x148] sm:$0xff] %vm763_vm1, %v732_v19  ;;  %v3136_v30 = vld [vmem:[#allocation2 + $0xb0] sm:$0xff]  ;;  %v754_v6 = vld [vmem:[%s3024_s14 + $0x1b8] sm:$0xff] }
  0x69   : > { %2479 = vmatmul.msk.f32.gmra.mxu0 %vm763_vm1, %v879_v20  ;;  %812 = vst.msk [vmem:[#allocation2 + $0x1e0] sm:$0xff] %vm763_vm1, %v747_v21  ;;  %v3148_v35 = vld [vmem:[#allocation2 + $0x118] sm:$0xff] }
  0x6a   : > { %767 = vst.msk [vmem:[#allocation2 + $0x18] sm:$0xff] %vm763_vm1, %v702_v23  ;;  %v860_v40 = vld [vmem:[#allocation2] sm:$0xff]  ;;  %v710_v20 = vld [vmem:[%s3024_s14 + $0x58] sm:$0xff]  ;;  %v756_v23 = vld [vmem:[%s3024_s14 + $0x1c8] sm:$0xff] }
  0x6b   : > { %798 = vst.msk [vmem:[#allocation2 + $0x150] sm:$0xff] %vm763_vm1, %v733_v24  ;;  %v1129_v41 = vld [vmem:[#allocation2 + $0x1] sm:$0xff] }
  0x6c   : > { %2484 = vmatmul.msk.f32.gmra.mxu1 %vm763_vm1, %v3116_v25  ;;  %813 = vst.msk [vmem:[#allocation2 + $0x1e8] sm:$0xff] %vm763_vm1, %v748_v26  ;;  %v3158_v37 = vld [vmem:[#allocation2 + $0xb8] sm:$0xff]  ;;  %v861_v47 = vld [vmem:[#allocation2 + $0x8] sm:$0xff] }
  0x6d   : > { %2488 = vmatmul.msk.f32.gmra.mxu2 %vm763_vm1, %v3121_v27  ;;  %768 = vst.msk [vmem:[#allocation2 + $0x20] sm:$0xff] %vm763_vm1, %v703_v29  ;;  %v1280_v42 = vld [vmem:[#allocation2 + $0x140] sm:$0xff] }
  0x6e   : > { %2492 = vmatmul.msk.f32.gmra.mxu3 %vm763_vm1, %v3124_v28  ;;  %799 = vst.msk [vmem:[#allocation2 + $0x158] sm:$0xff] %vm763_vm1, %v734_v31  ;;  %v1130_v48 = vld [vmem:[#allocation2 + $0x9] sm:$0xff]  ;;  %v711_v31 = vld [vmem:[%s3024_s14 + $0x60] sm:$0xff] }
  0x6f   : > { %814 = vst.msk [vmem:[#allocation2 + $0x1f0] sm:$0xff] %vm763_vm1, %v749_v32  ;;  %v1281_v49 = vld [vmem:[#allocation2 + $0x148] sm:$0xff]  ;;  %v3185_v54 = vld [vmem:[#allocation2 + $0x10] sm:$0xff] }
  0x70   : > { %3658 = vst [vmem:[#allocation5_spill] sm:$0xff] %v3148_v35  ;;  %v1431_v44 = vld [vmem:[#allocation2 + $0x1e0] sm:$0xff] }
  0x71   : > { %2480 = vmatmul.msk.f32.gmra.mxu0 %vm763_vm1, %v3136_v30  ;;  %769 = vst.msk [vmem:[#allocation2 + $0x28] sm:$0xff] %vm763_vm1, %v704_v36  ;;  %v3188_v55 = vld [vmem:[#allocation2 + $0x11] sm:$0xff] }
  0x72   : > { %800 = vst.msk [vmem:[#allocation2 + $0x160] sm:$0xff] %vm763_vm1, %v735_v38  ;;  %v1282_v56 = vld [vmem:[#allocation2 + $0x150] sm:$0xff]  ;;  %v3201_v61 = vld [vmem:[#allocation2 + $0x18] sm:$0xff] }
  0x73   : > { %815 = vst.msk [vmem:[#allocation2 + $0x1f8] sm:$0xff] %vm763_vm1, %v750_v39  ;;  %v1432_v51 = vld [vmem:[#allocation2 + $0x1e8] sm:$0xff]  ;;  %v742_v36 = vld [vmem:[%s3024_s14 + $0x158] sm:$0xff]  ;;  %v757_v38 = vld [vmem:[%s3024_s14 + $0x1d0] sm:$0xff] }
  0x74   : > { %2485 = vmatmul.msk.f32.gmra.mxu1 %vm763_vm1, %v3142_v33  ;;  %770 = vst.msk [vmem:[#allocation2 + $0x30] sm:$0xff] %vm763_vm1, %v705_v43  ;;  %v3204_v62 = vld [vmem:[#allocation2 + $0x19] sm:$0xff] }
  0x75   : > { %2489 = vmatmul.msk.f32.gmra.mxu2 %vm763_vm1, %v3146_v34  ;;  %801 = vst.msk [vmem:[#allocation2 + $0x168] sm:$0xff] %vm763_vm1, %v736_v45  ;;  %v1283_v0 = vld [vmem:[#allocation2 + $0x158] sm:$0xff]  ;;  %v3217_v7 = vld [vmem:[#allocation2 + $0x20] sm:$0xff] }
  0x76   : > { %2493 = vmatmul.msk.f32.gmra.mxu3 %vm763_vm1, %v3148_v35  ;;  %816 = vst.msk [vmem:[#allocation2 + $0x200] sm:$0xff] %vm763_vm1, %v751_v46  ;;  %v1433_v58 = vld [vmem:[#allocation2 + $0x1f0] sm:$0xff]  ;;  %v758_v45 = vld [vmem:[%s3024_s14 + $0x1d8] sm:$0xff] }
  0x77   : > { %771 = vst.msk [vmem:[#allocation2 + $0x38] sm:$0xff] %vm763_vm1, %v706_v50  ;;  %v1582_v35 = vld [vmem:[#allocation2 + $0x149] sm:$0xff] }
  0x78   : > { %802 = vst.msk [vmem:[#allocation2 + $0x170] sm:$0xff] %vm763_vm1, %v737_v52  ;;  %v3220_v8 = vld [vmem:[#allocation2 + $0x21] sm:$0xff] }
  0x79   : > { %2481 = vmatmul.msk.f32.gmra.mxu0 %vm763_vm1, %v3158_v37  ;;  %817 = vst.msk [vmem:[#allocation2 + $0x208] sm:$0xff] %vm763_vm1, %v752_v53  ;;  %v1284_v9 = vld [vmem:[#allocation2 + $0x160] sm:$0xff]  ;;  %v3233_v17 = vld [vmem:[#allocation2 + $0x28] sm:$0xff] }
  0x7a   : > { %772 = vst.msk [vmem:[#allocation2 + $0x40] sm:$0xff] %vm763_vm1, %v707_v57  ;;  %v1434_v4 = vld [vmem:[#allocation2 + $0x1f8] sm:$0xff]  ;;  %v759_v52 = vld [vmem:[%s3024_s14 + $0x1e0] sm:$0xff] }
  0x7b   : > { %803 = vst.msk [vmem:[#allocation2 + $0x178] sm:$0xff] %vm763_vm1, %v738_v59  ;;  %v3236_v18 = vld [vmem:[#allocation2 + $0x29] sm:$0xff] }
  0x7c   : > { %2495 = vmatmul.msk.f32.vlgmr.msrb.gmra.mxu1 %vm763_vm1, %v860_v40  ;;  %818 = vst.msk [vmem:[#allocation2 + $0x210] sm:$0xff] %vm763_vm1, %v753_v60  ;;  %v1285_v19 = vld [vmem:[#allocation2 + $0x168] sm:$0xff]  ;;  %v3249_v24 = vld [vmem:[#allocation2 + $0x30] sm:$0xff] }
  0x7d   : > { %2513 = vmatmul.msk.f32.vlgmr.msrb.gmra.mxu2 %vm763_vm1, %v1129_v41  ;;  %773 = vst.msk [vmem:[#allocation2 + $0x48] sm:$0xff] %vm763_vm1, %v708_v2  ;;  %v1435_v11 = vld [vmem:[#allocation2 + $0x200] sm:$0xff]  ;;  %v745_v60 = vld [vmem:[%s3024_s14 + $0x170] sm:$0xff] }
  0x7e   : > { %2531 = vmatmul.msk.f32.vlgmr.msrb.gmra.mxu3 %vm763_vm1, %v1280_v42  ;;  %804 = vst.msk [vmem:[#allocation2 + $0x180] sm:$0xff] %vm763_vm1, %v739_v5  ;;  %v3252_v26 = vld [vmem:[#allocation2 + $0x31] sm:$0xff]  ;;  %v712_v42 = vld [vmem:[%s3024_s14 + $0x68] sm:$0xff] }
  0x7f   : > { %819 = vst.msk [vmem:[#allocation2 + $0x218] sm:$0xff] %vm763_vm1, %v754_v6  ;;  %v1286_v29 = vld [vmem:[#allocation2 + $0x170] sm:$0xff]  ;;  %v3265_v39 = vld [vmem:[#allocation2 + $0x38] sm:$0xff]  ;;  %v828_v6 = vld [vmem:[%s3322_s6] sm:$0xff] }
  0x80   : > { %774 = vst.msk [vmem:[#allocation2 + $0x50] sm:$0xff] %vm763_vm1, %v709_v10  ;;  %v1436_v21 = vld [vmem:[#allocation2 + $0x208] sm:$0xff]  ;;  %v746_v10 = vld [vmem:[%s3024_s14 + $0x178] sm:$0xff] }
  0x81   : > { %2549 = vmatmul.msk.f32.vlgmr.msrb.gmra.mxu0 %vm763_vm1, %v1431_v44  ;;  %805 = vst.msk [vmem:[#allocation2 + $0x188] sm:$0xff] %vm763_vm1, %v740_v13  ;;  %v3268_v40 = vld [vmem:[#allocation2 + $0x39] sm:$0xff] }
  0x82   : > { %820 = vst.msk [vmem:[#allocation2 + $0x220] sm:$0xff] %vm763_vm1, %v755_v15  ;;  %v1287_v41 = vld [vmem:[#allocation2 + $0x178] sm:$0xff]  ;;  %v743_v44 = vld [vmem:[%s3024_s14 + $0x160] sm:$0xff] }
  0x83   : > { %775 = vst.msk [vmem:[#allocation2 + $0x58] sm:$0xff] %vm763_vm1, %v710_v20  ;;  %v1437_v32 = vld [vmem:[#allocation2 + $0x210] sm:$0xff]  ;;  %v3281_v46 = vld [vmem:[#allocation2 + $0x40] sm:$0xff] }
  0x84   : > { %2496 = vmatmul.msk.f32.gmra.mxu1 %vm763_vm1, %v861_v47  ;;  %806 = vst.msk [vmem:[#allocation2 + $0x190] sm:$0xff] %vm763_vm1, %v741_v22  ;;  %v3284_v47 = vld [vmem:[#allocation2 + $0x41] sm:$0xff] }
  0x85   : > { %2514 = vmatmul.msk.f32.gmra.mxu2 %vm763_vm1, %v1130_v48  ;;  %821 = vst.msk [vmem:[#allocation2 + $0x228] sm:$0xff] %vm763_vm1, %v756_v23  ;;  %v1288_v48 = vld [vmem:[#allocation2 + $0x180] sm:$0xff]  ;;  %v3297_v53 = vld [vmem:[#allocation2 + $0x48] sm:$0xff] }
  0x86   : > { %2532 = vmatmul.msk.f32.gmra.mxu3 %vm763_vm1, %v1281_v49  ;;  %776 = vst.msk [vmem:[#allocation2 + $0x60] sm:$0xff] %vm763_vm1, %v711_v31  ;;  %v1438_v43 = vld [vmem:[#allocation2 + $0x218] sm:$0xff]  ;;  %v713_v49 = vld [vmem:[%s3024_s14 + $0x70] sm:$0xff] }
  0x87   : > { %807 = vst.msk [vmem:[#allocation2 + $0x198] sm:$0xff] %vm763_vm1, %v742_v36  ;;  %v3315_v2 = vld [vmem:[#allocation2 + $0x50] sm:$0xff]  ;;  %v762_v31 = vld [vmem:[%s3024_s14 + $0x1f8] sm:$0xff] }
  0x88   : > { %822 = vst.msk [vmem:[#allocation2 + $0x230] sm:$0xff] %vm763_vm1, %v757_v38  ;;  %v1289_v57 = vld [vmem:[#allocation2 + $0x188] sm:$0xff] }
  0x89   : > { %2550 = vmatmul.msk.f32.gmra.mxu0 %vm763_vm1, %v1432_v51  ;;  %777 = vst.msk [vmem:[#allocation2 + $0x68] sm:$0xff] %vm763_vm1, %v712_v42  ;;  %v1439_v50 = vld [vmem:[#allocation2 + $0x220] sm:$0xff]  ;;  %v744_v51 = vld [vmem:[%s3024_s14 + $0x168] sm:$0xff] }
  0x8a   : > { %808 = vst.msk [vmem:[#allocation2 + $0x1a0] sm:$0xff] %vm763_vm1, %v743_v44  ;;  %v3333_v13 = vld [vmem:[#allocation2 + $0x58] sm:$0xff] }
  0x8b   : > { %823 = vst.msk [vmem:[#allocation2 + $0x238] sm:$0xff] %vm763_vm1, %v758_v45  ;;  %v1290_v5 = vld [vmem:[#allocation2 + $0x190] sm:$0xff] }
  0x8c   : > { %2497 = vmatmul.msk.f32.gmra.mxu1 %vm763_vm1, %v3185_v54  ;;  %778 = vst.msk [vmem:[#allocation2 + $0x70] sm:$0xff] %vm763_vm1, %v713_v49  ;;  %v1440_v59 = vld [vmem:[#allocation2 + $0x228] sm:$0xff] }
  0x8d   : > { %2515 = vmatmul.msk.f32.gmra.mxu2 %vm763_vm1, %v3188_v55  ;;  %809 = vst.msk [vmem:[#allocation2 + $0x1a8] sm:$0xff] %vm763_vm1, %v744_v51  ;;  %v3336_v15 = vld [vmem:[#allocation2 + $0x59] sm:$0xff] }
  0x8e   : > { %2533 = vmatmul.msk.f32.gmra.mxu3 %vm763_vm1, %v1282_v56  ;;  %824 = vst.msk [vmem:[#allocation2 + $0x240] sm:$0xff] %vm763_vm1, %v759_v52  ;;  %v3300_v56 = vld [vmem:[#allocation2 + $0x49] sm:$0xff]  ;;  %v3345_v22 = vld [vmem:[#allocation2 + $0x60] sm:$0xff] }
  0x8f   : > { %810 = vst.msk [vmem:[#allocation2 + $0x1b0] sm:$0xff] %vm763_vm1, %v745_v60 }
  0x90   : > { %844 = vst.msk [vmem:[#allocation2 + $0x80] sm:$0xff] %vm763_vm1, %v828_v6  ;;  %v3348_v23 = vld [vmem:[#allocation2 + $0x61] sm:$0xff] }
  0x91   : > { %2551 = vmatmul.msk.f32.gmra.mxu0 %vm763_vm1, %v1433_v58  ;;  %v714_v58 = vld [vmem:[%s3024_s14 + $0x78] sm:$0xff]  ;;  %811 = vst.msk [vmem:[#allocation2 + $0x1b8] sm:$0xff] %vm763_vm1, %v746_v10 }
  0x92   : > { %779 = vst.msk [vmem:[#allocation2 + $0x78] sm:$0xff] %vm763_vm1, %v714_v58  ;;  %v1442_v20 = vld [vmem:[#allocation2 + $0x238] sm:$0xff] }
  0x93   : > { %827 = vst.msk [vmem:[#allocation2 + $0x258] sm:$0xff] %vm763_vm1, %v762_v31  ;;  %v3366_v44 = vld [vmem:[#allocation2 + $0x69] sm:$0xff] }
  0x94   : > { %2498 = vmatmul.msk.f32.gmra.mxu1 %vm763_vm1, %v3201_v61  ;;  %v1293_v45 = vld [vmem:[#allocation2 + $0x1a8] sm:$0xff] }
  0x95   : > { %2516 = vmatmul.msk.f32.gmra.mxu2 %vm763_vm1, %v3204_v62  ;;  %v1443_v36 = vld [vmem:[#allocation2 + $0x240] sm:$0xff] }
  0x96   : > { %2534 = vmatmul.msk.f32.gmra.mxu3 %vm763_vm1, %v1283_v0  ;;  %v760_v0 = vld [vmem:[%s3024_s14 + $0x1e8] sm:$0xff] }
  0x97   : > { %825 = vst.msk [vmem:[#allocation2 + $0x248] sm:$0xff] %vm763_vm1, %v760_v0 }
  0x99   : > { %2552 = vmatmul.msk.f32.gmra.mxu0 %vm763_vm1, %v1434_v4  ;;  %v3318_v4 = vld [vmem:[#allocation2 + $0x51] sm:$0xff] }
  0x9a   : > { %v3382_v58 = vld [vmem:[#allocation2 + $0x71] sm:$0xff] }
  0x9b   : > { %v3395_v10 = vld [vmem:[#allocation2 + $0x78] sm:$0xff] }
  0x9c   : > { %2499 = vmatmul.msk.f32.gmra.mxu1 %vm763_vm1, %v3217_v7 }
  0x9d   : > { %2517 = vmatmul.msk.f32.gmra.mxu2 %vm763_vm1, %v3220_v8 }
  0x9e   : > { %2535 = vmatmul.msk.f32.gmra.mxu3 %vm763_vm1, %v1284_v9  ;;  %v1441_v9 = vld [vmem:[#allocation2 + $0x230] sm:$0xff]  ;;  %v1444_v49 = vld [vmem:[#allocation2 + $0x248] sm:$0xff] }
  0xa1   : > { %2553 = vmatmul.msk.f32.gmra.mxu0 %vm763_vm1, %v1435_v11  ;;  %v761_v11 = vld [vmem:[%s3024_s14 + $0x1f0] sm:$0xff] }
  0xa2   : > { %826 = vst.msk [vmem:[#allocation2 + $0x250] sm:$0xff] %vm763_vm1, %v761_v11  ;;  %v3398_v11 = vld [vmem:[#allocation2 + $0x79] sm:$0xff] }
  0xa3   : > { %3661 = vst [vmem:[#allocation8_spill] sm:$0xff] %v3398_v11 }
  0xa4   : > { %2500 = vmatmul.msk.f32.gmra.mxu1 %vm763_vm1, %v3233_v17 }
  0xa5   : > { %2518 = vmatmul.msk.f32.gmra.mxu2 %vm763_vm1, %v3236_v18 }
  0xa6   : > { %2536 = vmatmul.msk.f32.gmra.mxu3 %vm763_vm1, %v1285_v19  ;;  %v1291_v19 = vld [vmem:[#allocation2 + $0x198] sm:$0xff] }
  0xa9   : > { %2554 = vmatmul.msk.f32.gmra.mxu0 %vm763_vm1, %v1436_v21  ;;  %v1445_v0 = vld [vmem:[#allocation2 + $0x250] sm:$0xff] }
  0xac   : > { %2501 = vmatmul.msk.f32.gmra.mxu1 %vm763_vm1, %v3249_v24 }
  0xad   : > { %2519 = vmatmul.msk.f32.gmra.mxu2 %vm763_vm1, %v3252_v26 }
  0xae   : > { %2537 = vmatmul.msk.f32.gmra.mxu3 %vm763_vm1, %v1286_v29  ;;  %v1292_v29 = vld [vmem:[#allocation2 + $0x1a0] sm:$0xff] }
  0xb1   : > { %2555 = vmatmul.msk.f32.gmra.mxu0 %vm763_vm1, %v1437_v32 }
  0xb4   : > { %2502 = vmatmul.msk.f32.gmra.mxu1 %vm763_vm1, %v3265_v39 }
  0xb5   : > { %2520 = vmatmul.msk.f32.gmra.mxu2 %vm763_vm1, %v3268_v40 }
  0xb6   : > { %2538 = vmatmul.msk.f32.gmra.mxu3 %vm763_vm1, %v1287_v41 }
  0xb9   : > { %2556 = vmatmul.msk.f32.gmra.mxu0 %vm763_vm1, %v1438_v43  ;;  %v3363_v43 = vld [vmem:[#allocation2 + $0x68] sm:$0xff] }
  0xbc   : > { %2503 = vmatmul.msk.f32.gmra.mxu1 %vm763_vm1, %v3281_v46 }
  0xbd   : > { %2521 = vmatmul.msk.f32.gmra.mxu2 %vm763_vm1, %v3284_v47 }
  0xbe   : > { %2539 = vmatmul.msk.f32.gmra.mxu3 %vm763_vm1, %v1288_v48 }
  0xc1   : > { %2557 = vmatmul.msk.f32.gmra.mxu0 %vm763_vm1, %v1439_v50 }
  0xc4   : > { %2504 = vmatmul.msk.f32.gmra.mxu1 %vm763_vm1, %v3297_v53 }
  0xc5   : > { %2522 = vmatmul.msk.f32.gmra.mxu2 %vm763_vm1, %v3300_v56 }
  0xc6   : > { %2540 = vmatmul.msk.f32.gmra.mxu3 %vm763_vm1, %v1289_v57  ;;  %v3379_v57 = vld [vmem:[#allocation2 + $0x70] sm:$0xff] }
  0xc9   : > { %2558 = vmatmul.msk.f32.gmra.mxu0 %vm763_vm1, %v1440_v59  ;;  %v1294_v59 = vld [vmem:[#allocation2 + $0x1b0] sm:$0xff] }
  0xcc   : > { %2505 = vmatmul.msk.f32.gmra.mxu1 %vm763_vm1, %v3315_v2 }
  0xcd   : > { %2523 = vmatmul.msk.f32.gmra.mxu2 %vm763_vm1, %v3318_v4 }
  0xce   : > { %2541 = vmatmul.msk.f32.gmra.mxu3 %vm763_vm1, %v1290_v5 }
  0xd1   : > { %2559 = vmatmul.msk.f32.gmra.mxu0 %vm763_vm1, %v1441_v9 }
  0xd4   : > { %2506 = vmatmul.msk.f32.gmra.mxu1 %vm763_vm1, %v3333_v13 }
  0xd5   : > { %2524 = vmatmul.msk.f32.gmra.mxu2 %vm763_vm1, %v3336_v15 }
  0xd6   : > { %2542 = vmatmul.msk.f32.gmra.mxu3 %vm763_vm1, %v1291_v19  ;;  %v1295_v19 = vld [vmem:[#allocation2 + $0x1b8] sm:$0xff] }
  0xd9   : > { %v3343_v21 = vpop.f32.mrf.mxu1  ;;  %2560 = vmatmul.msk.f32.gmra.mxu0 %vm763_vm1, %v1442_v20 }
  0xdc   : > { %2507 = vmatmul.msk.f32.gmra.mxu1 %vm763_vm1, %v3345_v22 }
  0xdd   : > { %2525 = vmatmul.msk.f32.gmra.mxu2 %vm763_vm1, %v3348_v23 }
  0xde   : > { %2543 = vmatmul.msk.f32.gmra.mxu3 %vm763_vm1, %v1292_v29  ;;  %v965_v32 = vpop.f32.mrf.mxu0  ;;  %v1446_v29 = vld [vmem:[#allocation2 + $0x258] sm:$0xff] }
  0xe0   : > { %v3357_v38 = vpop.f32.mrf.mxu2 }
  0xe1   : > { %v3359_v41 = vpop.f32.mrf.mxu1  ;;  %v3361_v42 = vpop.f32.mrf.mxu3  ;;  %2561 = vmatmul.msk.f32.gmra.mxu0 %vm763_vm1, %v1443_v36 }
  0xe4   : > { %2508 = vmatmul.msk.f32.gmra.mxu1 %vm763_vm1, %v3363_v43 }
  0xe5   : > { %2526 = vmatmul.msk.f32.gmra.mxu2 %vm763_vm1, %v3366_v44 }
  0xe6   : > { %2544 = vmatmul.msk.f32.gmra.mxu3 %vm763_vm1, %v1293_v45  ;;  %v968_v48 = vpop.f32.mrf.mxu0 }
  0xe8   : > { %v3373_v50 = vpop.f32.mrf.mxu2 }
  0xe9   : > { %v3375_v51 = vpop.f32.mrf.mxu1  ;;  %v3377_v52 = vpop.f32.mrf.mxu3  ;;  %2562 = vmatmul.msk.f32.gmra.mxu0 %vm763_vm1, %v1444_v49  ;;  %v1581_v49 = vld [vmem:[#allocation2 + $0x141] sm:$0xff] }
  0xea   : > { %3659 = vst [vmem:[#allocation6_spill] sm:$0xff] %v3377_v52 }
  0xec   : > { %2509 = vmatmul.msk.f32.gmra.mxu1 %vm763_vm1, %v3379_v57 }
  0xed   : > { %2527 = vmatmul.msk.f32.gmra.mxu2 %vm763_vm1, %v3382_v58 }
  0xee   : > { %2545 = vmatmul.msk.f32.gmra.mxu3 %vm763_vm1, %v1294_v59  ;;  %v971_v60 = vpop.f32.mrf.mxu0 }
  0xf0   : > { %v3389_v5 = vpop.f32.mrf.mxu2 }
  0xf1   : > { %v3391_v6 = vpop.f32.mrf.mxu1  ;;  %v3393_v9 = vpop.f32.mrf.mxu3  ;;  %2563 = vmatmul.msk.f32.gmra.mxu0 %vm763_vm1, %v1445_v0 }
  0xf2   : > { %3660 = vst [vmem:[#allocation7_spill] sm:$0xff] %v3393_v9 }
  0xf4   : > { %2510 = vmatmul.msk.f32.gmra.mxu1 %vm763_vm1, %v3395_v10 }
  0xf5   : > { %2528 = vmatmul.msk.f32.gmra.mxu2 %vm763_vm1, %v3398_v11 }
  0xf6   : > { %2546 = vmatmul.msk.f32.gmra.mxu3 %vm763_vm1, %v1295_v19  ;;  %v974_v20 = vpop.f32.mrf.mxu0 }
  0xf8   : > { %v3405_v31 = vpop.f32.mrf.mxu2 }
  0xf9   : > { %v3407_v36 = vpop.f32.mrf.mxu3  ;;  %v1081_v45 = vpop.f32.mrf.mxu1  ;;  %2564 = vmatmul.msk.f32.gmra.mxu0 %vm763_vm1, %v1446_v29 }
  0xfa   : > { %3662 = vst [vmem:[#allocation9_spill] sm:$0xff] %v3407_v36  ;;  %v1082_v0 = vadd.f32 %v1081_v45, %v965_v32 }
  0xfc   : > { %2567 = vmatmul.msk.f32.vlgmr.msra.gmra.mxu1 %vm763_vm1, %v1581_v49 }
  0xfd   : > { %2585 = vmatmul.msk.f32.vlgmr.msra.gmra.mxu2 %vm763_vm1, %v3185_v54 }
  0xfe   : > { %2603 = vmatmul.msk.f32.vlgmr.msra.gmra.mxu3 %vm763_vm1, %v3136_v30  ;;  %v1517_v59 = vpop.f32.mrf.mxu0 }
 0x100   : > { %v1215_v19 = vpop.f32.mrf.mxu2 }
 0x101   : > { %v1263_v9 = vadd.f32 %v1215_v19, %v1082_v0  ;;  %v1084_v11 = vpop.f32.mrf.mxu1  ;;  %v1366_v52 = vpop.f32.mrf.mxu3  ;;  %2621 = vmatmul.msk.f32.vlgmr.msra.gmra.mxu0 %vm763_vm1, %v3188_v55  ;;  %v1583_v19 = vld [vmem:[#allocation2 + $0x151] sm:$0xff] }
 0x102   : > { %v1085_v54 = vadd.f32 %v1084_v11, %v968_v48 }
 0x103   : > { %v1414_v36 = vadd.f32 %v1366_v52, %v1263_v9 }
 0x104   : > { %2568 = vmatmul.msk.f32.gmra.mxu1 %vm763_vm1, %v1582_v35 }
 0x105   : > { %v3418_v29 = vadd.f32 %v1517_v59, %v1414_v36  ;;  %2586 = vmatmul.msk.f32.gmra.mxu2 %vm763_vm1, %v3201_v61  ;;  %v1584_v36 = vld [vmem:[#allocation2 + $0x159] sm:$0xff] }
 0x106   : > { %2604 = vmatmul.msk.f32.gmra.mxu3 %vm763_vm1, %v3158_v37  ;;  %v1520_v30 = vpop.f32.mrf.mxu0 }
 0x108   : > { %v1218_v32 = vpop.f32.mrf.mxu2 }
 0x109   : > { %v1264_v45 = vadd.f32 %v1218_v32, %v1085_v54  ;;  %v1087_v49 = vpop.f32.mrf.mxu1  ;;  %v1369_v0 = vpop.f32.mrf.mxu3  ;;  %2622 = vmatmul.msk.f32.gmra.mxu0 %vm763_vm1, %v3204_v62 }
 0x10a   : > { %v1088_v61 = vadd.f32 %v1087_v49, %v971_v60 }
 0x10b   : > { %v1415_v55 = vadd.f32 %v1369_v0, %v1264_v45  ;;  %v1585_v45 = vld [vmem:[#allocation2 + $0x161] sm:$0xff] }
 0x10c   : > { %2569 = vmatmul.msk.f32.gmra.mxu1 %vm763_vm1, %v1583_v19 }
 0x10d   : > { %v3427_v35 = vadd.f32 %v1520_v30, %v1415_v55  ;;  %2587 = vmatmul.msk.f32.gmra.mxu2 %vm763_vm1, %v3217_v7 }
 0x10e   : > { %2605 = vmatmul.msk.f32.gmra.mxu3 %vm763_vm1, %v3047_v63  ;;  %v1523_v37 = vpop.f32.mrf.mxu0 }
 0x110   : > { %v1221_v48 = vpop.f32.mrf.mxu2 }
 0x111   : > { %v1265_v52 = vadd.f32 %v1221_v48, %v1088_v61  ;;  %v1090_v9 = vpop.f32.mrf.mxu1  ;;  %v1372_v11 = vpop.f32.mrf.mxu3  ;;  %2623 = vmatmul.msk.f32.gmra.mxu0 %vm763_vm1, %v3220_v8 }
 0x112   : > { %v1091_v7 = vadd.f32 %v1090_v9, %v974_v20 }
 0x113   : > { %v1416_v62 = vadd.f32 %v1372_v11, %v1265_v52  ;;  %v1587_v11 = vld [vmem:[#allocation2 + $0x171] sm:$0xff] }
 0x114   : > { %2570 = vmatmul.msk.f32.gmra.mxu1 %vm763_vm1, %v1584_v36 }
 0x115   : > { %v3436_v59 = vadd.f32 %v1523_v37, %v1416_v62  ;;  %2588 = vmatmul.msk.f32.gmra.mxu2 %vm763_vm1, %v3233_v17  ;;  %v1586_v37 = vld [vmem:[#allocation2 + $0x169] sm:$0xff] }
 0x116   : > { %2606 = vmatmul.msk.f32.gmra.mxu3 %vm763_vm1, %v3083_v12  ;;  %v1526_v63 = vpop.f32.mrf.mxu0 }
 0x118   : > { %v1224_v60 = vpop.f32.mrf.mxu2 }
 0x119   : > { %v1266_v30 = vadd.f32 %v1224_v60, %v1091_v7  ;;  %v1093_v54 = vpop.f32.mrf.mxu1  ;;  %v1375_v32 = vpop.f32.mrf.mxu3  ;;  %2624 = vmatmul.msk.f32.gmra.mxu0 %vm763_vm1, %v3236_v18  ;;  %v1588_v60 = vld [vmem:[#allocation2 + $0x179] sm:$0xff] }
 0x11a   : > { %v1094_v17 = vadd.f32 %v1093_v54, %v3343_v21 }
 0x11b   : > { %v1417_v8 = vadd.f32 %v1375_v32, %v1266_v30 }
 0x11c   : > { %2571 = vmatmul.msk.f32.gmra.mxu1 %vm763_vm1, %v1585_v45 }
 0x11d   : > { %v3445_v49 = vadd.f32 %v1526_v63, %v1417_v8  ;;  %2589 = vmatmul.msk.f32.gmra.mxu2 %vm763_vm1, %v3249_v24  ;;  %v1589_v8 = vld [vmem:[#allocation2 + $0x181] sm:$0xff] }
 0x11e   : > { %2607 = vmatmul.msk.f32.gmra.mxu3 %vm763_vm1, %v3116_v25  ;;  %v1529_v12 = vpop.f32.mrf.mxu0 }
 0x120   : > { %v1227_v20 = vpop.f32.mrf.mxu2 }
 0x121   : > { %v1267_v0 = vadd.f32 %v1227_v20, %v1094_v17  ;;  %v1096_v19 = vpop.f32.mrf.mxu1  ;;  %v1378_v55 = vpop.f32.mrf.mxu3  ;;  %2625 = vmatmul.msk.f32.gmra.mxu0 %vm763_vm1, %v3252_v26 }
 0x122   : > { %v1097_v24 = vadd.f32 %v1096_v19, %v3359_v41 }
 0x123   : > { %v1418_v18 = vadd.f32 %v1378_v55, %v1267_v0 }
 0x124   : > { %2572 = vmatmul.msk.f32.gmra.mxu1 %vm763_vm1, %v1586_v37 }
 0x125   : > { %v3455_v61 = vadd.f32 %v1529_v12, %v1418_v18  ;;  %2590 = vmatmul.msk.f32.gmra.mxu2 %vm763_vm1, %v3265_v39 }
 0x126   : > { %2608 = vmatmul.msk.f32.gmra.mxu3 %vm763_vm1, %v3142_v33  ;;  %v1532_v25 = vpop.f32.mrf.mxu0 }
 0x128   : > { %v1230_v21 = vpop.f32.mrf.mxu2 }
 0x129   : > { %v1268_v48 = vadd.f32 %v1230_v21, %v1097_v24  ;;  %v1099_v52 = vpop.f32.mrf.mxu1  ;;  %v1381_v9 = vpop.f32.mrf.mxu3  ;;  %2626 = vmatmul.msk.f32.gmra.mxu0 %vm763_vm1, %v3268_v40  ;;  %v1591_v24 = vld [vmem:[#allocation2 + $0x191] sm:$0xff] }
 0x12a   : > { %v1100_v39 = vadd.f32 %v1099_v52, %v3375_v51 }
 0x12b   : > { %v1419_v26 = vadd.f32 %v1381_v9, %v1268_v48 }
 0x12c   : > { %2573 = vmatmul.msk.f32.gmra.mxu1 %vm763_vm1, %v1587_v11 }
 0x12d   : > { %v3465_v36 = vadd.f32 %v1532_v25, %v1419_v26  ;;  %2591 = vmatmul.msk.f32.gmra.mxu2 %vm763_vm1, %v3281_v46 }
 0x12e   : > { %2609 = vmatmul.msk.f32.gmra.mxu3 %vm763_vm1, %v3053_v1  ;;  %v1535_v33 = vpop.f32.mrf.mxu0 }
 0x130   : > { %v1233_v41 = vpop.f32.mrf.mxu2 }
 0x131   : > { %v1269_v62 = vadd.f32 %v1233_v41, %v1100_v39  ;;  %v1102_v63 = vpop.f32.mrf.mxu1  ;;  %v1384_v7 = vpop.f32.mrf.mxu3  ;;  %2627 = vmatmul.msk.f32.gmra.mxu0 %vm763_vm1, %v3284_v47  ;;  %v830_v41 = vld [vmem:[%s3322_s6 + $0x10] sm:$0xff] }
 0x132   : > { %v1103_v46 = vadd.f32 %v1102_v63, %v3391_v6  ;;  %846 = vst.msk [vmem:[#allocation2 + $0x90] sm:$0xff] %vm763_vm1, %v830_v41 }
 0x133   : > { %v1420_v40 = vadd.f32 %v1384_v7, %v1269_v62 }
 0x134   : > { %2574 = vmatmul.msk.f32.gmra.mxu1 %vm763_vm1, %v1588_v60 }
 0x135   : > { %v3475_v30 = vadd.f32 %v1535_v33, %v1420_v40  ;;  %2592 = vmatmul.msk.f32.gmra.mxu2 %vm763_vm1, %v3297_v53  ;;  %v1593_v40 = vld [vmem:[#allocation2 + $0x1a1] sm:$0xff] }
 0x136   : > { %2610 = vmatmul.msk.f32.gmra.mxu3 %vm763_vm1, %v3088_v14  ;;  %v1538_v1 = vpop.f32.mrf.mxu0 }
 0x138   : > { %v1236_v51 = vpop.f32.mrf.mxu2 }
 0x139   : > { %v1270_v54 = vadd.f32 %v1236_v51, %v1103_v46  ;;  %v1105_v32 = vpop.f32.mrf.mxu1  ;;  %v1387_v45 = vpop.f32.mrf.mxu3  ;;  %2628 = vmatmul.msk.f32.gmra.mxu0 %vm763_vm1, %v3300_v56  ;;  %v1590_v56 = vld [vmem:[#allocation2 + $0x189] sm:$0xff] }
 0x13a   : > { %v1106_v53 = vadd.f32 %v1105_v32, %v3357_v38  ;;  %v832_v38 = vld [vmem:[%s3322_s6 + $0x20] sm:$0xff] }
 0x13b   : > { %v1421_v47 = vadd.f32 %v1387_v45, %v1270_v54  ;;  %848 = vst.msk [vmem:[#allocation2 + $0x120] sm:$0xff] %vm763_vm1, %v832_v38  ;;  %v1594_v45 = vld [vmem:[#allocation2 + $0x1a9] sm:$0xff] }
 0x13c   : > { %2575 = vmatmul.msk.f32.gmra.mxu1 %vm763_vm1, %v1589_v8 }
 0x13d   : > { %v3485_v12 = vadd.f32 %v1538_v1, %v1421_v47  ;;  %2593 = vmatmul.msk.f32.gmra.mxu2 %vm763_vm1, %v3315_v2 }
 0x13e   : > { %2611 = vmatmul.msk.f32.gmra.mxu3 %vm763_vm1, %v3121_v27  ;;  %v1541_v14 = vpop.f32.mrf.mxu0 }
 0x140   : > { %v1239_v6 = vpop.f32.mrf.mxu2 }
 0x141   : > { %v1271_v17 = vadd.f32 %v1239_v6, %v1106_v53  ;;  %v1108_v20 = vpop.f32.mrf.mxu1  ;;  %v1390_v0 = vpop.f32.mrf.mxu3  ;;  %2629 = vmatmul.msk.f32.gmra.mxu0 %vm763_vm1, %v3318_v4 }
 0x142   : > { %v1109_v55 = vadd.f32 %v1108_v20, %v3373_v50  ;;  %v829_v50 = vld [vmem:[%s3322_s6 + $0x8] sm:$0xff]  ;;  %v1595_v20 = vld [vmem:[#allocation2 + $0x1b1] sm:$0xff] }
 0x143   : > { %v1422_v19 = vadd.f32 %v1390_v0, %v1271_v17  ;;  %845 = vst.msk [vmem:[#allocation2 + $0x88] sm:$0xff] %vm763_vm1, %v829_v50  ;;  %v1745_v0 = vld [vmem:[#allocation2 + $0x80] sm:$0xff] }
 0x144   : > { %2576 = vmatmul.msk.f32.gmra.mxu1 %vm763_vm1, %v1590_v56 }
 0x145   : > { %v3495_v2 = vadd.f32 %v1541_v14, %v1422_v19  ;;  %2594 = vmatmul.msk.f32.gmra.mxu2 %vm763_vm1, %v3333_v13  ;;  %v1895_v19 = vld [vmem:[#allocation2 + $0x120] sm:$0xff] }
 0x146   : > { %2612 = vmatmul.msk.f32.gmra.mxu3 %vm763_vm1, %v3146_v34  ;;  %v1544_v27 = vpop.f32.mrf.mxu0  ;;  %v836_v34 = vld [vmem:[%s3322_s6 + $0x40] sm:$0xff] }
 0x147   : > { %852 = vst.msk [vmem:[#allocation2 + $0x1c0] sm:$0xff] %vm763_vm1, %v836_v34 }
 0x148   : > { %v1242_v4 = vpop.f32.mrf.mxu2 }
 0x149   : > { %v1272_v37 = vadd.f32 %v1242_v4, %v1109_v55  ;;  %v1111_v18 = vpop.f32.mrf.mxu1  ;;  %v1393_v25 = vpop.f32.mrf.mxu3  ;;  %2630 = vmatmul.msk.f32.gmra.mxu0 %vm763_vm1, %v3336_v15  ;;  %v833_v15 = vld [vmem:[%s3322_s6 + $0x28] sm:$0xff]  ;;  %v3666_v55 = vld [vmem:[#allocation7_spill] sm:$0xff] }
 0x14a   : > { %v1112_v52 = vadd.f32 %v1111_v18, %v3389_v5  ;;  %849 = vst.msk [vmem:[#allocation2 + $0x128] sm:$0xff] %vm763_vm1, %v833_v15  ;;  %v2045_v38 = vld [vmem:[#allocation2 + $0x81] sm:$0xff] }
 0x14b   : > { %v1423_v13 = vadd.f32 %v1393_v25, %v1272_v37  ;;  %v1746_v34 = vld [vmem:[#allocation2 + $0x88] sm:$0xff] }
 0x14c   : > { %2577 = vmatmul.msk.f32.gmra.mxu1 %vm763_vm1, %v1591_v24 }
 0x14d   : > { %v3508_v21 = vadd.f32 %v1544_v27, %v1423_v13  ;;  %2595 = vmatmul.msk.f32.gmra.mxu2 %vm763_vm1, %v3345_v22  ;;  %v1592_v22 = vld [vmem:[#allocation2 + $0x199] sm:$0xff] }
 0x14e   : > { %2613 = vmatmul.msk.f32.gmra.mxu3 %vm763_vm1, %v3059_v3  ;;  %v1547_v48 = vpop.f32.mrf.mxu0  ;;  %v1596_v13 = vld [vmem:[#allocation2 + $0x1b9] sm:$0xff] }
 0x150   : > { %v1245_v9 = vpop.f32.mrf.mxu2 }
 0x151   : > { %v1273_v11 = vadd.f32 %v1245_v9, %v1112_v52  ;;  %v1114_v26 = vpop.f32.mrf.mxu1  ;;  %v1396_v33 = vpop.f32.mrf.mxu3  ;;  %2631 = vmatmul.msk.f32.gmra.mxu0 %vm763_vm1, %v3348_v23  ;;  %v2046_v9 = vld [vmem:[#allocation2 + $0x89] sm:$0xff] }
 0x152   : > { %v1115_v62 = vadd.f32 %v1114_v26, %v3405_v31 }
 0x153   : > { %v1424_v39 = vadd.f32 %v1396_v33, %v1273_v11  ;;  %v3667_v11 = vld [vmem:[#allocation9_spill] sm:$0xff] }
 0x154   : > { %2578 = vmatmul.msk.f32.gmra.mxu1 %vm763_vm1, %v1592_v22 }
 0x155   : > { %v3523_v3 = vadd.f32 %v1547_v48, %v1424_v39  ;;  %2596 = vmatmul.msk.f32.gmra.mxu2 %vm763_vm1, %v3363_v43  ;;  %v1896_v48 = vld [vmem:[#allocation2 + $0x128] sm:$0xff] }
 0x156   : > { %2614 = vmatmul.msk.f32.gmra.mxu3 %vm763_vm1, %v3092_v16  ;;  %v1550_v5 = vpop.f32.mrf.mxu0 }
 0x158   : > { %v1248_v63 = vpop.f32.mrf.mxu2 }
 0x159   : > { %v1274_v7 = vadd.f32 %v1248_v63, %v1115_v62  ;;  %v1117_v23 = vpop.f32.mrf.mxu1  ;;  %v1399_v60 = vpop.f32.mrf.mxu3  ;;  %2632 = vmatmul.msk.f32.gmra.mxu0 %vm763_vm1, %v3366_v44 }
 0x15a   : > { %v1118_v31 = vadd.f32 %v1117_v23, %v3361_v42 }
 0x15b   : > { %v1425_v1 = vadd.f32 %v1399_v60, %v1274_v7 }
 0x15c   : > { %2579 = vmatmul.msk.f32.gmra.mxu1 %vm763_vm1, %v1593_v40 }
 0x15d   : > { %v3535_v43 = vadd.f32 %v1550_v5, %v1425_v1  ;;  %2597 = vmatmul.msk.f32.gmra.mxu2 %vm763_vm1, %v3379_v57  ;;  %v3664_v57 = vld [vmem:[#allocation6_spill] sm:$0xff] }
 0x15e   : > { %2615 = vmatmul.msk.f32.gmra.mxu3 %vm763_vm1, %v3124_v28  ;;  %v1553_v16 = vpop.f32.mrf.mxu0  ;;  %v3663_v28 = vld [vmem:[#allocation5_spill] sm:$0xff] }
 0x160   : > { %v1251_v46 = vpop.f32.mrf.mxu2 }
 0x161   : > { %v1275_v51 = vadd.f32 %v1251_v46, %v1118_v31  ;;  %v1120_v54 = vpop.f32.mrf.mxu1  ;;  %v1402_v32 = vpop.f32.mrf.mxu3  ;;  %2633 = vmatmul.msk.f32.gmra.mxu0 %vm763_vm1, %v3382_v58  ;;  %v3665_v58 = vld [vmem:[#allocation8_spill] sm:$0xff]  ;;  %v3576_v31 = vld [vmem:[%s3648_s3] ss:$0 sm:$0xff] }
 0x162   : > { %v1121_v47 = vadd.f32 %v1120_v54, %v3664_v57 }
 0x163   : > { %v1426_v44 = vadd.f32 %v1402_v32, %v1275_v51 }
 0x164   : > { %2580 = vmatmul.msk.f32.gmra.mxu1 %vm763_vm1, %v1594_v45 }
 0x165   : > { %v3545_v8 = vadd.f32 %v1553_v16, %v1426_v44  ;;  %2598 = vmatmul.msk.f32.gmra.mxu2 %vm763_vm1, %v3395_v10 }
 0x166   : > { %2616 = vmatmul.msk.f32.gmra.mxu3 %vm763_vm1, %v3663_v28  ;;  %v1556_v42 = vpop.f32.mrf.mxu0 }
 0x168   : > { %v1254_v14 = vpop.f32.mrf.mxu2 }
 0x169   : > { %v1276_v53 = vadd.f32 %v1254_v14, %v1121_v47  ;;  %v1123_v6 = vpop.f32.mrf.mxu1  ;;  %v1405_v17 = vpop.f32.mrf.mxu3  ;;  %2634 = vmatmul.msk.f32.gmra.mxu0 %vm763_vm1, %v3665_v58 }
 0x16a   : > { %v1124_v4 = vadd.f32 %v1123_v6, %v3666_v55 }
 0x16b   : > { %v1427_v56 = vadd.f32 %v1405_v17, %v1276_v53 }
 0x16c   : > { %2581 = vmatmul.msk.f32.gmra.mxu1 %vm763_vm1, %v1595_v20 }
 0x16d   : > { %v3555_v10 = vadd.f32 %v1556_v42, %v1427_v56  ;;  %2599 = vmatmul.msk.f32.gmra.mxu2 %vm763_vm1, %v1745_v0 }
 0x16e   : > { %2617 = vmatmul.msk.f32.gmra.mxu3 %vm763_vm1, %v1895_v19  ;;  %v1559_v27 = vpop.f32.mrf.mxu0 }
 0x170   : > { %v1257_v37 = vpop.f32.mrf.mxu2 }
 0x171   : > { %v1277_v18 = vadd.f32 %v1257_v37, %v1124_v4  ;;  %v1126_v25 = vpop.f32.mrf.mxu1  ;;  %v1408_v24 = vpop.f32.mrf.mxu3  ;;  %2635 = vmatmul.msk.f32.gmra.mxu0 %vm763_vm1, %v2045_v38 }
 0x172   : > { %v1127_v26 = vadd.f32 %v1126_v25, %v3667_v11 }
 0x173   : > { %v1428_v50 = vadd.f32 %v1408_v24, %v1277_v18 }
 0x174   : > { %2582 = vmatmul.msk.f32.gmra.mxu1 %vm763_vm1, %v1596_v13 }
 0x175   : > { %v3562_v15 = vadd.f32 %v1559_v27, %v1428_v50  ;;  %2600 = vmatmul.msk.f32.gmra.mxu2 %vm763_vm1, %v1746_v34 }
 0x176   : > { %2618 = vmatmul.msk.f32.gmra.mxu3 %vm763_vm1, %v1896_v48  ;;  %v1562_v52 = vpop.f32.mrf.mxu0 }
 0x178   : > { %v1260_v33 = vpop.f32.mrf.mxu2 }
 0x179   : > { %v1278_v22 = vadd.f32 %v1260_v33, %v1127_v26  ;;  %v1411_v39 = vpop.f32.mrf.mxu3  ;;  %v1667_v5 = vpop.f32.mrf.mxu1  ;;  %2636 = vmatmul.msk.f32.gmra.mxu0 %vm763_vm1, %v2046_v9 }
 0x17a   : > { %v1715_v7 = vadd.f32 %v1667_v5, %v3418_v29 }
 0x17b   : > { %v1429_v41 = vadd.f32 %v1411_v39, %v1278_v22 }
 0x17d   : > { %v3569_v62 = vadd.f32 %v1562_v52, %v1429_v41 }
 0x17e   : > { %v2117_v63 = vpop.f32.mrf.mxu0 }
 0x180   : > { %v1817_v23 = vpop.f32.mrf.mxu2 }
 0x181   : > { %v1865_v60 = vadd.f32 %v1817_v23, %v1715_v7  ;;  %v1670_v40 = vpop.f32.mrf.mxu1  ;;  %v1967_v1 = vpop.f32.mrf.mxu3 }
 0x182   : > { %v1716_v51 = vadd.f32 %v1670_v40, %v3427_v35 }
 0x183   : > { %v2015_v16 = vadd.f32 %v1967_v1, %v1865_v60 }
 0x185   : > { %v2165_v46 = vadd.f32 %v2117_v63, %v2015_v16 }
 0x186   : > { %v2120_v29 = vpop.f32.mrf.mxu0 }
 0x187   : > { %v2197_v54 = vadd.f32 %v3576_v31, %v2165_v46 }
 0x188   : > { %v1820_v32 = vpop.f32.mrf.mxu2 }
 0x189   : > { %2213 = vst [vmem:[%s3581_s10] sm:$0xff] %v2197_v54  ;;  %v1866_v45 = vadd.f32 %v1820_v32, %v1716_v51  ;;  %v1673_v44 = vpop.f32.mrf.mxu1  ;;  %v1970_v28 = vpop.f32.mrf.mxu3 }
 0x18a   : > { %v1717_v14 = vadd.f32 %v1673_v44, %v3436_v59 }
 0x18b   : > { %v2016_v42 = vadd.f32 %v1970_v28, %v1866_v45 }
 0x18d   : > { %v2166_v57 = vadd.f32 %v2120_v29, %v2016_v42 }
 0x18e   : > { %v2123_v47 = vpop.f32.mrf.mxu0 }
 0x18f   : > { %v2198_v53 = vadd.f32 %v3576_v31, %v2166_v57 }
 0x190   : > { %v1823_v6 = vpop.f32.mrf.mxu2 }
 0x191   : > { %2214 = vst [vmem:[%s3581_s10 + $0x8] sm:$0xff] %v2198_v53  ;;  %v1867_v17 = vadd.f32 %v1823_v6, %v1717_v14  ;;  %v1676_v20 = vpop.f32.mrf.mxu1  ;;  %v1973_v35 = vpop.f32.mrf.mxu3 }
 0x192   : > { %v1718_v19 = vadd.f32 %v1676_v20, %v3445_v49 }
 0x193   : > { %v2017_v58 = vadd.f32 %v1973_v35, %v1867_v17 }
 0x195   : > { %v2167_v0 = vadd.f32 %v2123_v47, %v2017_v58 }
 0x196   : > { %v2126_v56 = vpop.f32.mrf.mxu0 }
 0x197   : > { %v2199_v27 = vadd.f32 %v3576_v31, %v2167_v0 }
 0x198   : > { %v1826_v38 = vpop.f32.mrf.mxu2 }
 0x199   : > { %2215 = vst [vmem:[%s3581_s10 + $0x10] sm:$0xff] %v2199_v27  ;;  %v1868_v55 = vadd.f32 %v1826_v38, %v1718_v19  ;;  %v1679_v4 = vpop.f32.mrf.mxu1  ;;  %v1976_v59 = vpop.f32.mrf.mxu3 }
 0x19a   : > { %v1719_v24 = vadd.f32 %v1679_v4, %v3455_v61 }
 0x19b   : > { %v2018_v37 = vadd.f32 %v1976_v59, %v1868_v55 }
 0x19d   : > { %v2168_v18 = vadd.f32 %v2126_v56, %v2018_v37 }
 0x19e   : > { %v2129_v25 = vpop.f32.mrf.mxu0 }
 0x19f   : > { %v2200_v13 = vadd.f32 %v3576_v31, %v2168_v18 }
 0x1a0   : > { %v1829_v34 = vpop.f32.mrf.mxu2 }
 0x1a1   : > { %2216 = vst [vmem:[%s3581_s10 + $0x18] sm:$0xff] %v2200_v13  ;;  %v1869_v50 = vadd.f32 %v1829_v34, %v1719_v24  ;;  %v1682_v48 = vpop.f32.mrf.mxu1  ;;  %v1979_v49 = vpop.f32.mrf.mxu3 }
 0x1a2   : > { %v1720_v26 = vadd.f32 %v1682_v48, %v3465_v36 }
 0x1a3   : > { %v2019_v52 = vadd.f32 %v1979_v49, %v1869_v50 }
 0x1a5   : > { %v2169_v9 = vadd.f32 %v2129_v25, %v2019_v52 }
 0x1a6   : > { %v2132_v11 = vpop.f32.mrf.mxu0 }
 0x1a7   : > { %v2201_v33 = vadd.f32 %v3576_v31, %v2169_v9 }
 0x1a8   : > { %v1832_v22 = vpop.f32.mrf.mxu2 }
 0x1a9   : > { %2217 = vst [vmem:[%s3581_s10 + $0x20] sm:$0xff] %v2201_v33  ;;  %v1870_v39 = vadd.f32 %v1832_v22, %v1720_v26  ;;  %v1685_v5 = vpop.f32.mrf.mxu1  ;;  %v1982_v61 = vpop.f32.mrf.mxu3 }
 0x1aa   : > { %v1721_v23 = vadd.f32 %v1685_v5, %v3475_v30 }
 0x1ab   : > { %v2020_v41 = vadd.f32 %v1982_v61, %v1870_v39 }
 0x1ad   : > { %v2170_v63 = vadd.f32 %v2132_v11, %v2020_v41 }
 0x1ae   : > { %v2135_v7 = vpop.f32.mrf.mxu0 }
 0x1af   : > { %v2202_v60 = vadd.f32 %v3576_v31, %v2170_v63 }
 0x1b0   : > { %v1835_v40 = vpop.f32.mrf.mxu2 }
 0x1b1   : > { %2218 = vst [vmem:[%s3581_s10 + $0x28] sm:$0xff] %v2202_v60  ;;  %v1871_v1 = vadd.f32 %v1835_v40, %v1721_v23  ;;  %v1688_v16 = vpop.f32.mrf.mxu1  ;;  %v1985_v36 = vpop.f32.mrf.mxu3 }
 0x1b2   : > { %v1722_v54 = vadd.f32 %v1688_v16, %v3485_v12 }
 0x1b3   : > { %v2021_v46 = vadd.f32 %v1985_v36, %v1871_v1 }
 0x1b5   : > { %v2171_v29 = vadd.f32 %v2135_v7, %v2021_v46 }
 0x1b6   : > { %v2138_v51 = vpop.f32.mrf.mxu0 }
 0x1b7   : > { %v2203_v32 = vadd.f32 %v3576_v31, %v2171_v29 }
 0x1b8   : > { %v1838_v45 = vpop.f32.mrf.mxu2 }
 0x1b9   : > { %2219 = vst [vmem:[%s3581_s10 + $0x30] sm:$0xff] %v2203_v32  ;;  %v1872_v44 = vadd.f32 %v1838_v45, %v1722_v54  ;;  %v1691_v28 = vpop.f32.mrf.mxu1  ;;  %v1988_v30 = vpop.f32.mrf.mxu3 }
 0x1ba   : > { %v1723_v14 = vadd.f32 %v1691_v28, %v3495_v2 }
 0x1bb   : > { %v2022_v42 = vadd.f32 %v1988_v30, %v1872_v44 }
 0x1bd   : > { %v2172_v57 = vadd.f32 %v2138_v51, %v2022_v42 }
 0x1be   : > { %v2141_v47 = vpop.f32.mrf.mxu0 }
 0x1bf   : > { %v2204_v53 = vadd.f32 %v3576_v31, %v2172_v57 }
 0x1c0   : > { %v1841_v6 = vpop.f32.mrf.mxu2 }
 0x1c1   : > { %2220 = vst [vmem:[%s3581_s10 + $0x38] sm:$0xff] %v2204_v53  ;;  %v1873_v17 = vadd.f32 %v1841_v6, %v1723_v14  ;;  %v1694_v20 = vpop.f32.mrf.mxu1  ;;  %v1991_v12 = vpop.f32.mrf.mxu3 }
 0x1c2   : > { %v1724_v56 = vadd.f32 %v1694_v20, %v3508_v21 }
 0x1c3   : > { %v2023_v35 = vadd.f32 %v1991_v12, %v1873_v17 }
 0x1c5   : > { %v2173_v58 = vadd.f32 %v2141_v47, %v2023_v35 }
 0x1c6   : > { %v2144_v0 = vpop.f32.mrf.mxu0 }
 0x1c7   : > { %v2205_v19 = vadd.f32 %v3576_v31, %v2173_v58 }
 0x1c8   : > { %v1844_v27 = vpop.f32.mrf.mxu2 }
 0x1c9   : > { %2221 = vst [vmem:[%s3581_s10 + $0x40] sm:$0xff] %v2205_v19  ;;  %v1874_v38 = vadd.f32 %v1844_v27, %v1724_v56  ;;  %v1697_v55 = vpop.f32.mrf.mxu1  ;;  %v1994_v2 = vpop.f32.mrf.mxu3 }
 0x1ca   : > { %v1725_v18 = vadd.f32 %v1697_v55, %v3523_v3 }
 0x1cb   : > { %v2024_v4 = vadd.f32 %v1994_v2, %v1874_v38 }
 0x1cd   : > { %v2174_v59 = vadd.f32 %v2144_v0, %v2024_v4 }
 0x1ce   : > { %v2147_v37 = vpop.f32.mrf.mxu0 }
 0x1cf   : > { %v2206_v25 = vadd.f32 %v3576_v31, %v2174_v59 }
 0x1d0   : > { %v1847_v24 = vpop.f32.mrf.mxu2 }
 0x1d1   : > { %2222 = vst [vmem:[%s3581_s10 + $0x48] sm:$0xff] %v2206_v25  ;;  %v1875_v13 = vadd.f32 %v1847_v24, %v1725_v18  ;;  %v1700_v34 = vpop.f32.mrf.mxu1  ;;  %v1997_v21 = vpop.f32.mrf.mxu3 }
 0x1d2   : > { %v1726_v52 = vadd.f32 %v1700_v34, %v3535_v43 }
 0x1d3   : > { %v2025_v50 = vadd.f32 %v1997_v21, %v1875_v13 }
 0x1d5   : > { %v2175_v48 = vadd.f32 %v2147_v37, %v2025_v50 }
 0x1d6   : > { %v2150_v49 = vpop.f32.mrf.mxu0 }
 0x1d7   : > { %v2207_v9 = vadd.f32 %v3576_v31, %v2175_v48 }
 0x1d8   : > { %v1850_v11 = vpop.f32.mrf.mxu2 }
 0x1d9   : > { %2223 = vst [vmem:[%s3581_s10 + $0x50] sm:$0xff] %v2207_v9  ;;  %v1876_v26 = vadd.f32 %v1850_v11, %v1726_v52  ;;  %v1703_v33 = vpop.f32.mrf.mxu1  ;;  %v2000_v3 = vpop.f32.mrf.mxu3 }
 0x1da   : > { %v1727_v61 = vadd.f32 %v1703_v33, %v3545_v8 }
 0x1db   : > { %v2026_v22 = vadd.f32 %v2000_v3, %v1876_v26 }
 0x1dd   : > { %v2176_v39 = vadd.f32 %v2150_v49, %v2026_v22 }
 0x1de   : > { %v2153_v5 = vpop.f32.mrf.mxu0 }
 0x1df   : > { %v2208_v41 = vadd.f32 %v3576_v31, %v2176_v39 }
 0x1e0   : > { %v1853_v63 = vpop.f32.mrf.mxu2 }
 0x1e1   : > { %2224 = vst [vmem:[%s3581_s10 + $0x58] sm:$0xff] %v2208_v41  ;;  %v1877_v7 = vadd.f32 %v1853_v63, %v1727_v61  ;;  %v1706_v23 = vpop.f32.mrf.mxu1  ;;  %v2003_v43 = vpop.f32.mrf.mxu3 }
 0x1e2   : > { %v1728_v16 = vadd.f32 %v1706_v23, %v3555_v10 }
 0x1e3   : > { %v2027_v60 = vadd.f32 %v2003_v43, %v1877_v7 }
 0x1e5   : > { %v2177_v40 = vadd.f32 %v2153_v5, %v2027_v60 }
 0x1e6   : > { %v2156_v1 = vpop.f32.mrf.mxu0 }
 0x1e7   : > { %v2209_v36 = vadd.f32 %v3576_v31, %v2177_v40 }
 0x1e8   : > { %v1856_v46 = vpop.f32.mrf.mxu2 }
 0x1e9   : > { %2225 = vst [vmem:[%s3581_s10 + $0x60] sm:$0xff] %v2209_v36  ;;  %v1878_v29 = vadd.f32 %v1856_v46, %v1728_v16  ;;  %v2006_v51 = vpop.f32.mrf.mxu3  ;;  %v1709_v8 = vpop.f32.mrf.mxu1 }
 0x1ea   : > { %v1729_v45 = vadd.f32 %v1709_v8, %v3562_v15 }
 0x1eb   : > { %v2028_v54 = vadd.f32 %v2006_v51, %v1878_v29 }
 0x1ed   : > { %v2178_v32 = vadd.f32 %v2156_v1, %v2028_v54 }
 0x1ee   : > { %v2159_v30 = vpop.f32.mrf.mxu0 }
 0x1ef   : > { %v2210_v44 = vadd.f32 %v3576_v31, %v2178_v32 }
 0x1f0   : > { %v1859_v28 = vpop.f32.mrf.mxu2 }
 0x1f1   : > { %2226 = vst [vmem:[%s3581_s10 + $0x68] sm:$0xff] %v2210_v44  ;;  %v1879_v42 = vadd.f32 %v1859_v28, %v1729_v45  ;;  %v2009_v10 = vpop.f32.mrf.mxu3  ;;  %v1712_v47 = vpop.f32.mrf.mxu1 }
 0x1f2   : > { %v1730_v53 = vadd.f32 %v1712_v47, %v3569_v62 }
 0x1f3   : > { %v2029_v57 = vadd.f32 %v2009_v10, %v1879_v42 }
 0x1f5   : > { %v2179_v14 = vadd.f32 %v2159_v30, %v2029_v57 }
 0x1f6   : > { %v2162_v15 = vpop.f32.mrf.mxu0 }
 0x1f7   : > { %v2211_v6 = vadd.f32 %v3576_v31, %v2179_v14 }
 0x1f8   : > { %v1862_v17 = vpop.f32.mrf.mxu2 }
 0x1f9   : > { %2227 = vst [vmem:[%s3581_s10 + $0x70] sm:$0xff] %v2211_v6  ;;  %v1880_v20 = vadd.f32 %v1862_v17, %v1730_v53  ;;  %v2012_v12 = vpop.f32.mrf.mxu3 }
 0x1fb   : > { %v2030_v35 = vadd.f32 %v2012_v12, %v1880_v20 }
 0x1fd   : > { %v2180_v58 = vadd.f32 %v2162_v15, %v2030_v35 }
 0x1ff   : > { %v2212_v0 = vadd.f32 %v3576_v31, %v2180_v58 }
 0x201   : > { %2228 = vst [vmem:[%s3581_s10 + $0x78] sm:$0xff] %v2212_v0 }
 0x202 PF: > { %s14_s19 = sadd.s32 1, %s2771_s19   ;;  %s3668_s15 = smov %s2759_s16 }
 0x203   : > { %p11_p12 = scmp.ge.s32.totalorder %s14_s19, 4   ;;  %s3669_s16 = smov %s2853_s24 }
 0x204   : > { %s3670_s17 = smov %s2767_s18  ;;  %s3671_s18 = smov %s3673_s20 }
 0x205   :  { %13 = sbr.rel (!%p11_p12) target bundleno = 3 (0x3), region = 220 }

</bundles_post_ra>
